<compile_context>
chip_gen: v6e
topology: v6e:2x2x1
jax: 0.10.0
libtpu: 0.0.40
codegen_flags: <defaults>
</compile_context>

<pallas_src>
import functools
import math

import jax
import jax.numpy as jnp
from jax import lax
from jax.experimental import pallas as pl
from jax.experimental.pallas import tpu as pltpu

_LANE = 128


def _round_up(n, m=_LANE):
    return ((n + m - 1) // m) * m


# ----------------------------- in-kernel helpers -----------------------------

def _softmax(x):
    m = jnp.max(x, axis=-1, keepdims=True)
    e = jnp.exp(x - m)
    return e * pl.reciprocal(jnp.sum(e, axis=-1, keepdims=True), approx=True)


def _layernorm(x, gamma, beta, mask, n_true, eps=1e-5):
    # Mean / variance over the TRUE feature width only; padded lanes of x are
    # zero and are masked out of the variance, so padding never leaks in.
    inv_n = 1.0 / n_true
    mu = jnp.sum(x, axis=-1, keepdims=True) * inv_n
    diff = jnp.where(mask, x - mu, 0.0)
    var = jnp.sum(diff * diff, axis=-1, keepdims=True) * inv_n
    return diff * lax.rsqrt(var + eps) * gamma + beta


# ----------------------------- fused kernel ----------------------------------

def _fused_kernel(x_ref, wqkv_ref, wo_ref, w1_ref, w2_ref, vecs_ref,
                  cwq_ref, cwkv_ref, cwol_ref, cvecs_ref, o_ref,
                  *, true_d, compute_dtype):
    cd = compute_dtype
    Bb, S, Dp = x_ref.shape
    nb = wqkv_ref.shape[0]
    Hp = wqkv_ref.shape[2] // 3
    Fp = w1_ref.shape[2]
    dvp = cwol_ref.shape[1]
    rows = Bb * S

    x0 = x_ref[...].astype(jnp.float32)             # (Bb, S, Dp) exact f32
    x = x0.reshape(rows, Dp)                        # flat rows for all linears

    # Lane mask over the TRUE feature width (hoisted: JAX does not CSE iota).
    feat_mask = lax.broadcasted_iota(jnp.int32, (rows, Dp), 1) < true_d

    # -------- encoder blocks: activation stays resident in VMEM/vregs -------
    for blk in range(nb):                           # nb is small & static
        wqkv = wqkv_ref[blk]                        # (Dp, 3Hp) bf16
        wo = wo_ref[blk]                            # (Hp, Dp)  bf16
        w1 = w1_ref[blk]                            # (Dp, Fp)  bf16
        w2 = w2_ref[blk]                            # (Fp, Dp)  bf16
        vec = vecs_ref[blk]                         # (16, Wv)  f32 packed vectors

        # Fused QKV projection over all B*S rows (1/sqrt(H) folded in wq/bq).
        qkv = jnp.dot(x.astype(cd), wqkv, preferred_element_type=jnp.float32)
        q = (qkv[:, :Hp] + vec[0:1, :Hp]).reshape(Bb, S, Hp)
        k = (qkv[:, Hp:2 * Hp] + vec[1:2, :Hp]).reshape(Bb, S, Hp)
        v = (qkv[:, 2 * Hp:] + vec[2:3, :Hp]).reshape(Bb, S, Hp)

        s = jnp.einsum('bqd,bkd->bqk', q.astype(cd), k.astype(cd),
                       preferred_element_type=jnp.float32)
        p = _softmax(s)                             # (Bb, S, S) f32
        ctx = jnp.einsum('bqk,bkd->bqd', p.astype(cd), v.astype(cd),
                         preferred_element_type=jnp.float32).reshape(rows, Hp)
        att = jnp.dot(ctx.astype(cd), wo,
                      preferred_element_type=jnp.float32) + vec[3:4, :Dp]

        # residual + LayerNorm 1
        h1 = _layernorm(x + att, vec[4:5, :Dp], vec[5:6, :Dp], feat_mask, true_d)

        # FFN: Linear -> ReLU -> Linear   (dropout == identity in eval mode)
        f = jnp.maximum(jnp.dot(h1.astype(cd), w1,
                                preferred_element_type=jnp.float32)
                        + vec[6:7, :Fp], 0.0)
        f = jnp.dot(f.astype(cd), w2,
                    preferred_element_type=jnp.float32) + vec[7:8, :Dp]

        # residual + LayerNorm 2
        x = _layernorm(h1 + f, vec[8:9, :Dp], vec[9:10, :Dp], feat_mask, true_d)

    # -------- cross attention dpnn5(enc, enc, Q) + folded final Linear ------
    cvec = cvecs_ref[...]                           # (8, Wv) f32
    # Query projection uses the ORIGINAL Q, which lives in its lane slot of
    # X0; cwq_ref has the (dq, H) weight embedded at those rows (pre-scaled).
    qc = (jnp.dot(x0.reshape(rows, Dp).astype(cd), cwq_ref[...],
                  preferred_element_type=jnp.float32)
          + cvec[0:1, :Hp]).reshape(Bb, S, Hp)
    kv = jnp.dot(x.astype(cd), cwkv_ref[...],
                 preferred_element_type=jnp.float32)      # (rows, 2Hp) fused K|V
    kc = (kv[:, :Hp] + cvec[1:2, :Hp]).reshape(Bb, S, Hp)
    vc = (kv[:, Hp:] + cvec[2:3, :Hp]).reshape(Bb, S, Hp)

    s = jnp.einsum('bqd,bkd->bqk', qc.astype(cd), kc.astype(cd),
                   preferred_element_type=jnp.float32)
    p = _softmax(s)
    ctx = jnp.einsum('bqk,bkd->bqd', p.astype(cd), vc.astype(cd),
                     preferred_element_type=jnp.float32).reshape(rows, Hp)
    # cross-attention output projection and final nn.Linear folded at pack time
    out = jnp.dot(ctx.astype(cd), cwol_ref[...],
                  preferred_element_type=jnp.float32) + cvec[3:4, :dvp]
    o_ref[...] = out.reshape(Bb, S, dvp).astype(o_ref.dtype)   # lane-dense store


# ----------------------------- wrapper ----------------------------------------

def transf_enc_dec_forward(K, V, Q, packed, *, input_v, fold_batch=True):
    B, S, dk = K.shape
    dvv = V.shape[2]
    dq = Q.shape[2]
    D = dk + dvv + dq
    Dp = packed["wqkv"].shape[1]
    dvp = packed["cwol"].shape[1]

    # Wrapper-side layout plumbing (free): X0 = [K|V|Q|0...] lane-dense f32.
    x0 = jnp.concatenate([K, V, Q], axis=2).astype(jnp.float32)
    x0 = jnp.pad(x0, ((0, 0), (0, 0), (0, Dp - D)))

    # fold_batch=True: one grid step over the whole batch (single-TC v5e/v6e).
    # fold_batch=False: grid=(B,) 'parallel' (useful on v7x with 2 TCs, B>=2).
    bb = B if fold_batch else 1
    grid = (B // bb,)

    weight_args = (packed["wqkv"], packed["wo"], packed["w1"], packed["w2"],
                   packed["vecs"], packed["cwq"], packed["cwkv"],
                   packed["cwol"], packed["cvecs"])

    def _full(a):
        nd = a.ndim
        # Constant index_map: each weight is DMA'd once and never revisited.
        return pl.BlockSpec(a.shape, lambda b, nd=nd: (0,) * nd)

    in_specs = [pl.BlockSpec((bb, S, Dp), lambda b: (b, 0, 0))]
    in_specs += [_full(a) for a in weight_args]

    out_padded = pl.pallas_call(
        functools.partial(_fused_kernel, true_d=D,
                          compute_dtype=packed["compute_dtype"]),
        out_shape=jax.ShapeDtypeStruct((B, S, dvp), K.dtype),
        grid=grid,
        in_specs=in_specs,
        out_specs=pl.BlockSpec((bb, S, dvp), lambda b: (b, 0, 0)),
        compiler_params=pltpu.CompilerParams(
            dimension_semantics=("parallel",)),
    )(x0, *weight_args)
    return out_padded[..., :input_v]               # slice back to true width


# ----------------------------- params: init + packing -------------------------

def _init_linear(key, fan_in, fan_out):
    kw, kb = jax.random.split(key)
    bound = 1.0 / math.sqrt(fan_in)
    w = jax.random.uniform(kw, (fan_in, fan_out), jnp.float32, -bound, bound)
    b = jax.random.uniform(kb, (fan_out,), jnp.float32, -bound, bound)
    return w, b


def init_params(key, input_k, input_q, input_v, hidden_size, dim_feedforward, num_blk):
    D = input_k + input_q + input_v
    keys = jax.random.split(key, num_blk + 1)
    blocks = []
    for i in range(num_blk):
        ks = jax.random.split(keys[i], 8)
        wq, bq = _init_linear(ks[0], D, hidden_size)
        wk, bk = _init_linear(ks[1], D, hidden_size)
        wv, bv = _init_linear(ks[2], D, hidden_size)
        wo, bo = _init_linear(ks[3], hidden_size, D)
        w1, b1 = _init_linear(ks[4], D, dim_feedforward)
        w2, b2 = _init_linear(ks[5], dim_feedforward, D)
        blocks.append(dict(
            wq=wq, bq=bq, wk=wk, bk=bk, wv=wv, bv=bv, wo=wo, bo=bo,
            g1=jnp.ones((D,), jnp.float32), be1=jnp.zeros((D,), jnp.float32),
            w1=w1, b1=b1, w2=w2, b2=b2,
            g2=jnp.ones((D,), jnp.float32), be2=jnp.zeros((D,), jnp.float32)))
    kc = jax.random.split(keys[-1], 5)
    cwk, cbk = _init_linear(kc[0], D, hidden_size)
    cwq, cbq = _init_linear(kc[1], input_q, hidden_size)
    cwv, cbv = _init_linear(kc[2], D, hidden_size)
    cwo, cbo = _init_linear(kc[3], hidden_size, D)
    wl, bl = _init_linear(kc[4], D, input_v)
    cross = dict(cwq=cwq, cbq=cbq, cwk=cwk, cbk=cbk, cwv=cwv, cbv=cbv,
                 cwo=cwo, cbo=cbo, wl=wl, bl=bl)
    return dict(blocks=blocks, cross=cross)


def _pad2(w, rows, cols):
    return jnp.zeros((rows, cols), jnp.float32).at[:w.shape[0], :w.shape[1]].set(w)


def _pad1(v, width):
    return jnp.zeros((width,), jnp.float32).at[:v.shape[0]].set(v)


def _stack_rows(vectors, width):
    """Stack small vectors into a (rows_pad, width) f32 slab (sublane multiple)."""
    arr = jnp.stack([_pad1(v, width) for v in vectors])
    rpad = _round_up(arr.shape[0], 8)
    return jnp.pad(arr, ((0, rpad - arr.shape[0]), (0, 0)))


def pack_params(params, *, hidden_size, dim_feedforward, input_k, input_q, input_v,
                compute_dtype=jnp.bfloat16):
    """Pad to lane-dense widths, fuse QKV / KV weights, fold the softmax scale
    and the final Linear at pack time, stack per-block weights, and pack all
    small bias / LayerNorm vectors into one slab per group."""
    D = input_k + input_q + input_v
    Dp = _round_up(D)
    Hp = _round_up(hidden_size)
    Fp = _round_up(dim_feedforward)
    dvp = _round_up(input_v)
    Wv = max(Hp, Dp, Fp, dvp)
    scale = 1.0 / math.sqrt(hidden_size)

    wqkv, wo, w1, w2, vecs = [], [], [], [], []
    for p in params["blocks"]:
        wqkv.append(jnp.concatenate([_pad2(p["wq"] * scale, Dp, Hp),
                                     _pad2(p["wk"], Dp, Hp),
                                     _pad2(p["wv"], Dp, Hp)], axis=1))
        wo.append(_pad2(p["wo"], Hp, Dp))
        w1.append(_pad2(p["w1"], Dp, Fp))
        w2.append(_pad2(p["w2"], Fp, Dp))
        vecs.append(_stack_rows(
            [p["bq"] * scale, p["bk"], p["bv"], p["bo"],
             p["g1"], p["be1"], p["b1"], p["b2"], p["g2"], p["be2"]], Wv))

    c = params["cross"]
    # Cross-attention query weight embedded at Q's lane slot inside X0=[K|V|Q|0].
    q_off = input_k + input_v
    cwq_emb = jnp.zeros((Dp, Hp), jnp.float32).at[
        q_off:q_off + input_q, :hidden_size].set(c["cwq"] * scale)
    # Fold final nn.Linear into the cross-attention output projection
    # (no nonlinearity in between; dropout is eval-mode identity).
    cwol = c["cwo"] @ c["wl"]                       # (H, input_v)
    cbl = c["cbo"] @ c["wl"] + c["bl"]              # (input_v,)

    return dict(
        wqkv=jnp.stack(wqkv).astype(compute_dtype),          # (nb, Dp, 3Hp)
        wo=jnp.stack(wo).astype(compute_dtype),              # (nb, Hp, Dp)
        w1=jnp.stack(w1).astype(compute_dtype),              # (nb, Dp, Fp)
        w2=jnp.stack(w2).astype(compute_dtype),              # (nb, Fp, Dp)
        vecs=jnp.stack(vecs),                                # (nb, 16, Wv) f32
        cwq=cwq_emb.astype(compute_dtype),                   # (Dp, Hp)
        cwkv=jnp.concatenate([_pad2(c["cwk"], Dp, Hp),
                              _pad2(c["cwv"], Dp, Hp)], axis=1
                             ).astype(compute_dtype),        # (Dp, 2Hp)
        cwol=_pad2(cwol, Hp, dvp).astype(compute_dtype),     # (Hp, dvp) fused
        cvecs=_stack_rows([c["cbq"] * scale, c["cbk"], c["cbv"], cbl], Wv),
        compute_dtype=compute_dtype,
    )


# ----------------------------- main --------------------------------------------

if __name__ == "__main__":
    B, S = 2, 8
    input_k, input_q, input_v = 4, 4, 4
    hidden_size = 16
    dim_feedforward = 32
    num_blk = 2

    root = jax.random.PRNGKey(0)
    kK, kV, kQ, kP = jax.random.split(root, 4)
    K = jax.random.normal(kK, (B, S, input_k), jnp.float32)
    V = jax.random.normal(kV, (B, S, input_v), jnp.float32)
    Q = jax.random.normal(kQ, (B, S, input_q), jnp.float32)

    params = init_params(kP, input_k, input_q, input_v, hidden_size,
                         dim_feedforward, num_blk)
    packed = pack_params(params, hidden_size=hidden_size,
                         dim_feedforward=dim_feedforward,
                         input_k=input_k, input_q=input_q, input_v=input_v)

    out = transf_enc_dec_forward(K, V, Q, packed, input_v=input_v)
    out = jax.block_until_ready(out)
    assert out.shape == (B, S, input_v), out.shape
    assert jnp.all(jnp.isfinite(out))
    print("KERNEL_OK")
</pallas_src>

<mosaic_0001>
module attributes {stable_mosaic.version = 11 : i64} {
  func.func @_fused_kernel(%arg0: i32, %arg1: memref<2x8x128xf32, #tpu.memory_space<vmem>>, %arg2: memref<2x128x384xbf16, #tpu.memory_space<vmem>>, %arg3: memref<2x128x128xbf16, #tpu.memory_space<vmem>>, %arg4: memref<2x128x128xbf16, #tpu.memory_space<vmem>>, %arg5: memref<2x128x128xbf16, #tpu.memory_space<vmem>>, %arg6: memref<2x16x128xf32, #tpu.memory_space<vmem>>, %arg7: memref<128x128xbf16, #tpu.memory_space<vmem>>, %arg8: memref<128x256xbf16, #tpu.memory_space<vmem>>, %arg9: memref<128x128xbf16, #tpu.memory_space<vmem>>, %arg10: memref<8x128xf32, #tpu.memory_space<vmem>>, %arg11: memref<2x8x128xf32, #tpu.memory_space<vmem>>) attributes {dimension_semantics = [#tpu.dimension_semantics<parallel>], iteration_bounds = array<i64: 1>, scalar_prefetch = 0 : i64, scratch_operands = 0 : i64, tpu.core_type = #tpu.core_type<tc>, window_params = [{transform_indices = @transform_0, window_bounds = array<i64: 2, 8, 128>}, {pipeline_mode = #tpu.pipeline_mode<synchronous>, transform_indices = @transform_1, window_bounds = array<i64: 2, 128, 384>}, {pipeline_mode = #tpu.pipeline_mode<synchronous>, transform_indices = @transform_2, window_bounds = array<i64: 2, 128, 128>}, {pipeline_mode = #tpu.pipeline_mode<synchronous>, transform_indices = @transform_3, window_bounds = array<i64: 2, 128, 128>}, {pipeline_mode = #tpu.pipeline_mode<synchronous>, transform_indices = @transform_4, window_bounds = array<i64: 2, 128, 128>}, {pipeline_mode = #tpu.pipeline_mode<synchronous>, transform_indices = @transform_5, window_bounds = array<i64: 2, 16, 128>}, {pipeline_mode = #tpu.pipeline_mode<synchronous>, transform_indices = @transform_6, window_bounds = array<i64: 128, 128>}, {pipeline_mode = #tpu.pipeline_mode<synchronous>, transform_indices = @transform_7, window_bounds = array<i64: 128, 256>}, {pipeline_mode = #tpu.pipeline_mode<synchronous>, transform_indices = @transform_8, window_bounds = array<i64: 128, 128>}, {pipeline_mode = #tpu.pipeline_mode<synchronous>, transform_indices = @transform_9, window_bounds = array<i64: 8, 128>}, {transform_indices = @transform_10, window_bounds = array<i64: 2, 8, 128>}]} {
    %c0 = arith.constant 0 : index
    %c0_0 = arith.constant 0 : index
    %c0_1 = arith.constant 0 : index
    %0 = vector.load %arg1[%c0, %c0_0, %c0_1] : memref<2x8x128xf32, #tpu.memory_space<vmem>>, vector<2x8x128xf32>
    %1 = vector.shape_cast %0 : vector<2x8x128xf32> to vector<16x128xf32>
    %2 = tpu.iota {dimensions = array<i32: 1>} : vector<16x128xi32>
    %c12_i32 = arith.constant 12 : i32
    %3 = vector.broadcast %c12_i32 : i32 to vector<16x128xi32>
    %4 = arith.cmpi slt, %2, %3 : vector<16x128xi32>
    %c0_2 = arith.constant 0 : index
    %c0_3 = arith.constant 0 : index
    %c0_4 = arith.constant 0 : index
    %5 = vector.load %arg2[%c0_2, %c0_3, %c0_4] : memref<2x128x384xbf16, #tpu.memory_space<vmem>>, vector<1x128x384xbf16>
    %6 = vector.shape_cast %5 : vector<1x128x384xbf16> to vector<128x384xbf16>
    %c0_5 = arith.constant 0 : index
    %c0_6 = arith.constant 0 : index
    %c0_7 = arith.constant 0 : index
    %7 = vector.load %arg3[%c0_5, %c0_6, %c0_7] : memref<2x128x128xbf16, #tpu.memory_space<vmem>>, vector<1x128x128xbf16>
    %8 = vector.shape_cast %7 : vector<1x128x128xbf16> to vector<128x128xbf16>
    %c0_8 = arith.constant 0 : index
    %c0_9 = arith.constant 0 : index
    %c0_10 = arith.constant 0 : index
    %9 = vector.load %arg4[%c0_8, %c0_9, %c0_10] : memref<2x128x128xbf16, #tpu.memory_space<vmem>>, vector<1x128x128xbf16>
    %10 = vector.shape_cast %9 : vector<1x128x128xbf16> to vector<128x128xbf16>
    %c0_11 = arith.constant 0 : index
    %c0_12 = arith.constant 0 : index
    %c0_13 = arith.constant 0 : index
    %11 = vector.load %arg5[%c0_11, %c0_12, %c0_13] : memref<2x128x128xbf16, #tpu.memory_space<vmem>>, vector<1x128x128xbf16>
    %12 = vector.shape_cast %11 : vector<1x128x128xbf16> to vector<128x128xbf16>
    %c0_14 = arith.constant 0 : index
    %c0_15 = arith.constant 0 : index
    %c0_16 = arith.constant 0 : index
    %13 = vector.load %arg6[%c0_14, %c0_15, %c0_16] : memref<2x16x128xf32, #tpu.memory_space<vmem>>, vector<1x16x128xf32>
    %14 = vector.shape_cast %13 : vector<1x16x128xf32> to vector<16x128xf32>
    %15 = arith.truncf %1 : vector<16x128xf32> to vector<16x128xbf16>
    %cst = arith.constant dense<0.000000e+00> : vector<16x384xf32>
    %16 = tpu.matmul %15, %6, %cst {dimension_numbers = #tpu.dot_dimension_numbers<[1], [0], [0], [1], [0, 0, 1, 1], [], []>} : vector<16x128xbf16>, vector<128x384xbf16>, vector<16x384xf32> -> vector<16x384xf32>
    %17 = vector.extract_strided_slice %16 {offsets = [0, 0], sizes = [16, 128], strides = [1, 1]} : vector<16x384xf32> to vector<16x128xf32>
    %18 = vector.extract_strided_slice %14 {offsets = [0, 0], sizes = [1, 128], strides = [1, 1]} : vector<16x128xf32> to vector<1x128xf32>
    %19 = vector.broadcast %18 : vector<1x128xf32> to vector<16x128xf32>
    %20 = arith.addf %17, %19 : vector<16x128xf32>
    %21 = vector.shape_cast %20 : vector<16x128xf32> to vector<2x8x128xf32>
    %22 = vector.extract_strided_slice %16 {offsets = [0, 128], sizes = [16, 128], strides = [1, 1]} : vector<16x384xf32> to vector<16x128xf32>
    %23 = vector.extract_strided_slice %14 {offsets = [1, 0], sizes = [1, 128], strides = [1, 1]} : vector<16x128xf32> to vector<1x128xf32>
    %24 = vector.broadcast %23 : vector<1x128xf32> to vector<16x128xf32>
    %25 = arith.addf %22, %24 : vector<16x128xf32>
    %26 = vector.shape_cast %25 : vector<16x128xf32> to vector<2x8x128xf32>
    %27 = vector.extract_strided_slice %16 {offsets = [0, 256], sizes = [16, 128], strides = [1, 1]} : vector<16x384xf32> to vector<16x128xf32>
    %28 = vector.extract_strided_slice %14 {offsets = [2, 0], sizes = [1, 128], strides = [1, 1]} : vector<16x128xf32> to vector<1x128xf32>
    %29 = vector.broadcast %28 : vector<1x128xf32> to vector<16x128xf32>
    %30 = arith.addf %27, %29 : vector<16x128xf32>
    %31 = vector.shape_cast %30 : vector<16x128xf32> to vector<2x8x128xf32>
    %32 = arith.truncf %21 : vector<2x8x128xf32> to vector<2x8x128xbf16>
    %33 = arith.truncf %26 : vector<2x8x128xf32> to vector<2x8x128xbf16>
    "tpu.trace_start"() <{level = 10 : i32, message = "bqd,bkd->bqk"}> : () -> ()
    %cst_17 = arith.constant dense<0.000000e+00> : vector<2x8x8xf32>
    %34 = tpu.matmul %32, %33, %cst_17 {dimension_numbers = #tpu.dot_dimension_numbers<[2], [2], [1], [1], [0, 0, 0, 1, 1, 1], [0], [0]>} : vector<2x8x128xbf16>, vector<2x8x128xbf16>, vector<2x8x8xf32> -> vector<2x8x8xf32>
    "tpu.trace_stop"() : () -> ()
    %cst_18 = arith.constant dense<0xFF800000> : vector<2x8xf32>
    %35 = vector.multi_reduction <maximumf>, %34, %cst_18 [2] : vector<2x8x8xf32> to vector<2x8xf32>
    %36 = vector.shape_cast %35 : vector<2x8xf32> to vector<2x8x1xf32>
    %37 = vector.broadcast %36 : vector<2x8x1xf32> to vector<2x8x8xf32>
    %38 = arith.subf %34, %37 : vector<2x8x8xf32>
    %39 = math.exp %38 : vector<2x8x8xf32>
    %cst_19 = arith.constant dense<0.000000e+00> : vector<2x8xf32>
    %40 = vector.multi_reduction <add>, %39, %cst_19 [2] : vector<2x8x8xf32> to vector<2x8xf32>
    %41 = vector.shape_cast %40 : vector<2x8xf32> to vector<2x8x1xf32>
    %42 = tpu.reciprocal %41 {approx = true} : vector<2x8x1xf32> -> vector<2x8x1xf32>
    %43 = vector.broadcast %42 : vector<2x8x1xf32> to vector<2x8x8xf32>
    %44 = arith.mulf %39, %43 : vector<2x8x8xf32>
    %45 = arith.truncf %44 : vector<2x8x8xf32> to vector<2x8x8xbf16>
    %46 = arith.truncf %31 : vector<2x8x128xf32> to vector<2x8x128xbf16>
    "tpu.trace_start"() <{level = 10 : i32, message = "bqk,bkd->bqd"}> : () -> ()
    %cst_20 = arith.constant dense<0.000000e+00> : vector<2x8x128xf32>
    %47 = tpu.matmul %45, %46, %cst_20 {dimension_numbers = #tpu.dot_dimension_numbers<[2], [1], [1], [2], [0, 0, 0, 1, 1, 2], [0], [0]>} : vector<2x8x8xbf16>, vector<2x8x128xbf16>, vector<2x8x128xf32> -> vector<2x8x128xf32>
    "tpu.trace_stop"() : () -> ()
    %48 = vector.shape_cast %47 : vector<2x8x128xf32> to vector<16x128xf32>
    %49 = arith.truncf %48 : vector<16x128xf32> to vector<16x128xbf16>
    %cst_21 = arith.constant dense<0.000000e+00> : vector<16x128xf32>
    %50 = tpu.matmul %49, %8, %cst_21 {dimension_numbers = #tpu.dot_dimension_numbers<[1], [0], [0], [1], [0, 0, 1, 1], [], []>} : vector<16x128xbf16>, vector<128x128xbf16>, vector<16x128xf32> -> vector<16x128xf32>
    %51 = vector.extract_strided_slice %14 {offsets = [3, 0], sizes = [1, 128], strides = [1, 1]} : vector<16x128xf32> to vector<1x128xf32>
    %52 = vector.broadcast %51 : vector<1x128xf32> to vector<16x128xf32>
    %53 = arith.addf %50, %52 : vector<16x128xf32>
    %54 = arith.addf %1, %53 : vector<16x128xf32>
    %55 = vector.extract_strided_slice %14 {offsets = [4, 0], sizes = [1, 128], strides = [1, 1]} : vector<16x128xf32> to vector<1x128xf32>
    %56 = vector.extract_strided_slice %14 {offsets = [5, 0], sizes = [1, 128], strides = [1, 1]} : vector<16x128xf32> to vector<1x128xf32>
    %cst_22 = arith.constant dense<0.000000e+00> : vector<16xf32>
    %57 = vector.multi_reduction <add>, %54, %cst_22 [1] : vector<16x128xf32> to vector<16xf32>
    %58 = vector.shape_cast %57 : vector<16xf32> to vector<16x1xf32>
    %cst_23 = arith.constant 0.0833333358 : f32
    %59 = vector.broadcast %cst_23 : f32 to vector<16x1xf32>
    %60 = arith.mulf %58, %59 : vector<16x1xf32>
    %61 = vector.broadcast %60 : vector<16x1xf32> to vector<16x128xf32>
    %62 = arith.subf %54, %61 : vector<16x128xf32>
    %cst_24 = arith.constant 0.000000e+00 : f32
    %63 = vector.broadcast %cst_24 : f32 to vector<16x128xf32>
    %64 = arith.select %4, %62, %63 : vector<16x128xi1>, vector<16x128xf32>
    %65 = arith.mulf %64, %64 : vector<16x128xf32>
    %cst_25 = arith.constant dense<0.000000e+00> : vector<16xf32>
    %66 = vector.multi_reduction <add>, %65, %cst_25 [1] : vector<16x128xf32> to vector<16xf32>
    %67 = vector.shape_cast %66 : vector<16xf32> to vector<16x1xf32>
    %cst_26 = arith.constant 0.0833333358 : f32
    %68 = vector.broadcast %cst_26 : f32 to vector<16x1xf32>
    %69 = arith.mulf %67, %68 : vector<16x1xf32>
    %cst_27 = arith.constant 9.99999974E-6 : f32
    %70 = vector.broadcast %cst_27 : f32 to vector<16x1xf32>
    %71 = arith.addf %69, %70 : vector<16x1xf32>
    %72 = math.rsqrt %71 : vector<16x1xf32>
    %73 = vector.broadcast %72 : vector<16x1xf32> to vector<16x128xf32>
    %74 = arith.mulf %64, %73 : vector<16x128xf32>
    %75 = vector.broadcast %55 : vector<1x128xf32> to vector<16x128xf32>
    %76 = arith.mulf %74, %75 : vector<16x128xf32>
    %77 = vector.broadcast %56 : vector<1x128xf32> to vector<16x128xf32>
    %78 = arith.addf %76, %77 : vector<16x128xf32>
    %79 = arith.truncf %78 : vector<16x128xf32> to vector<16x128xbf16>
    %cst_28 = arith.constant dense<0.000000e+00> : vector<16x128xf32>
    %80 = tpu.matmul %79, %10, %cst_28 {dimension_numbers = #tpu.dot_dimension_numbers<[1], [0], [0], [1], [0, 0, 1, 1], [], []>} : vector<16x128xbf16>, vector<128x128xbf16>, vector<16x128xf32> -> vector<16x128xf32>
    %81 = vector.extract_strided_slice %14 {offsets = [6, 0], sizes = [1, 128], strides = [1, 1]} : vector<16x128xf32> to vector<1x128xf32>
    %82 = vector.broadcast %81 : vector<1x128xf32> to vector<16x128xf32>
    %83 = arith.addf %80, %82 : vector<16x128xf32>
    %cst_29 = arith.constant 0.000000e+00 : f32
    %84 = vector.broadcast %cst_29 : f32 to vector<16x128xf32>
    %85 = arith.maximumf %83, %84 : vector<16x128xf32>
    %86 = arith.truncf %85 : vector<16x128xf32> to vector<16x128xbf16>
    %cst_30 = arith.constant dense<0.000000e+00> : vector<16x128xf32>
    %87 = tpu.matmul %86, %12, %cst_30 {dimension_numbers = #tpu.dot_dimension_numbers<[1], [0], [0], [1], [0, 0, 1, 1], [], []>} : vector<16x128xbf16>, vector<128x128xbf16>, vector<16x128xf32> -> vector<16x128xf32>
    %88 = vector.extract_strided_slice %14 {offsets = [7, 0], sizes = [1, 128], strides = [1, 1]} : vector<16x128xf32> to vector<1x128xf32>
    %89 = vector.broadcast %88 : vector<1x128xf32> to vector<16x128xf32>
    %90 = arith.addf %87, %89 : vector<16x128xf32>
    %91 = arith.addf %78, %90 : vector<16x128xf32>
    %92 = vector.extract_strided_slice %14 {offsets = [8, 0], sizes = [1, 128], strides = [1, 1]} : vector<16x128xf32> to vector<1x128xf32>
    %93 = vector.extract_strided_slice %14 {offsets = [9, 0], sizes = [1, 128], strides = [1, 1]} : vector<16x128xf32> to vector<1x128xf32>
    %cst_31 = arith.constant dense<0.000000e+00> : vector<16xf32>
    %94 = vector.multi_reduction <add>, %91, %cst_31 [1] : vector<16x128xf32> to vector<16xf32>
    %95 = vector.shape_cast %94 : vector<16xf32> to vector<16x1xf32>
    %cst_32 = arith.constant 0.0833333358 : f32
    %96 = vector.broadcast %cst_32 : f32 to vector<16x1xf32>
    %97 = arith.mulf %95, %96 : vector<16x1xf32>
    %98 = vector.broadcast %97 : vector<16x1xf32> to vector<16x128xf32>
    %99 = arith.subf %91, %98 : vector<16x128xf32>
    %cst_33 = arith.constant 0.000000e+00 : f32
    %100 = vector.broadcast %cst_33 : f32 to vector<16x128xf32>
    %101 = arith.select %4, %99, %100 : vector<16x128xi1>, vector<16x128xf32>
    %102 = arith.mulf %101, %101 : vector<16x128xf32>
    %cst_34 = arith.constant dense<0.000000e+00> : vector<16xf32>
    %103 = vector.multi_reduction <add>, %102, %cst_34 [1] : vector<16x128xf32> to vector<16xf32>
    %104 = vector.shape_cast %103 : vector<16xf32> to vector<16x1xf32>
    %cst_35 = arith.constant 0.0833333358 : f32
    %105 = vector.broadcast %cst_35 : f32 to vector<16x1xf32>
    %106 = arith.mulf %104, %105 : vector<16x1xf32>
    %cst_36 = arith.constant 9.99999974E-6 : f32
    %107 = vector.broadcast %cst_36 : f32 to vector<16x1xf32>
    %108 = arith.addf %106, %107 : vector<16x1xf32>
    %109 = math.rsqrt %108 : vector<16x1xf32>
    %110 = vector.broadcast %109 : vector<16x1xf32> to vector<16x128xf32>
    %111 = arith.mulf %101, %110 : vector<16x128xf32>
    %112 = vector.broadcast %92 : vector<1x128xf32> to vector<16x128xf32>
    %113 = arith.mulf %111, %112 : vector<16x128xf32>
    %114 = vector.broadcast %93 : vector<1x128xf32> to vector<16x128xf32>
    %115 = arith.addf %113, %114 : vector<16x128xf32>
    %c1 = arith.constant 1 : index
    %c0_37 = arith.constant 0 : index
    %c0_38 = arith.constant 0 : index
    %116 = vector.load %arg2[%c1, %c0_37, %c0_38] : memref<2x128x384xbf16, #tpu.memory_space<vmem>>, vector<1x128x384xbf16>
    %117 = vector.shape_cast %116 : vector<1x128x384xbf16> to vector<128x384xbf16>
    %c1_39 = arith.constant 1 : index
    %c0_40 = arith.constant 0 : index
    %c0_41 = arith.constant 0 : index
    %118 = vector.load %arg3[%c1_39, %c0_40, %c0_41] : memref<2x128x128xbf16, #tpu.memory_space<vmem>>, vector<1x128x128xbf16>
    %119 = vector.shape_cast %118 : vector<1x128x128xbf16> to vector<128x128xbf16>
    %c1_42 = arith.constant 1 : index
    %c0_43 = arith.constant 0 : index
    %c0_44 = arith.constant 0 : index
    %120 = vector.load %arg4[%c1_42, %c0_43, %c0_44] : memref<2x128x128xbf16, #tpu.memory_space<vmem>>, vector<1x128x128xbf16>
    %121 = vector.shape_cast %120 : vector<1x128x128xbf16> to vector<128x128xbf16>
    %c1_45 = arith.constant 1 : index
    %c0_46 = arith.constant 0 : index
    %c0_47 = arith.constant 0 : index
    %122 = vector.load %arg5[%c1_45, %c0_46, %c0_47] : memref<2x128x128xbf16, #tpu.memory_space<vmem>>, vector<1x128x128xbf16>
    %123 = vector.shape_cast %122 : vector<1x128x128xbf16> to vector<128x128xbf16>
    %c1_48 = arith.constant 1 : index
    %c0_49 = arith.constant 0 : index
    %c0_50 = arith.constant 0 : index
    %124 = vector.load %arg6[%c1_48, %c0_49, %c0_50] : memref<2x16x128xf32, #tpu.memory_space<vmem>>, vector<1x16x128xf32>
    %125 = vector.shape_cast %124 : vector<1x16x128xf32> to vector<16x128xf32>
    %126 = arith.truncf %115 : vector<16x128xf32> to vector<16x128xbf16>
    %cst_51 = arith.constant dense<0.000000e+00> : vector<16x384xf32>
    %127 = tpu.matmul %126, %117, %cst_51 {dimension_numbers = #tpu.dot_dimension_numbers<[1], [0], [0], [1], [0, 0, 1, 1], [], []>} : vector<16x128xbf16>, vector<128x384xbf16>, vector<16x384xf32> -> vector<16x384xf32>
    %128 = vector.extract_strided_slice %127 {offsets = [0, 0], sizes = [16, 128], strides = [1, 1]} : vector<16x384xf32> to vector<16x128xf32>
    %129 = vector.extract_strided_slice %125 {offsets = [0, 0], sizes = [1, 128], strides = [1, 1]} : vector<16x128xf32> to vector<1x128xf32>
    %130 = vector.broadcast %129 : vector<1x128xf32> to vector<16x128xf32>
    %131 = arith.addf %128, %130 : vector<16x128xf32>
    %132 = vector.shape_cast %131 : vector<16x128xf32> to vector<2x8x128xf32>
    %133 = vector.extract_strided_slice %127 {offsets = [0, 128], sizes = [16, 128], strides = [1, 1]} : vector<16x384xf32> to vector<16x128xf32>
    %134 = vector.extract_strided_slice %125 {offsets = [1, 0], sizes = [1, 128], strides = [1, 1]} : vector<16x128xf32> to vector<1x128xf32>
    %135 = vector.broadcast %134 : vector<1x128xf32> to vector<16x128xf32>
    %136 = arith.addf %133, %135 : vector<16x128xf32>
    %137 = vector.shape_cast %136 : vector<16x128xf32> to vector<2x8x128xf32>
    %138 = vector.extract_strided_slice %127 {offsets = [0, 256], sizes = [16, 128], strides = [1, 1]} : vector<16x384xf32> to vector<16x128xf32>
    %139 = vector.extract_strided_slice %125 {offsets = [2, 0], sizes = [1, 128], strides = [1, 1]} : vector<16x128xf32> to vector<1x128xf32>
    %140 = vector.broadcast %139 : vector<1x128xf32> to vector<16x128xf32>
    %141 = arith.addf %138, %140 : vector<16x128xf32>
    %142 = vector.shape_cast %141 : vector<16x128xf32> to vector<2x8x128xf32>
    %143 = arith.truncf %132 : vector<2x8x128xf32> to vector<2x8x128xbf16>
    %144 = arith.truncf %137 : vector<2x8x128xf32> to vector<2x8x128xbf16>
    "tpu.trace_start"() <{level = 10 : i32, message = "bqd,bkd->bqk"}> : () -> ()
    %cst_52 = arith.constant dense<0.000000e+00> : vector<2x8x8xf32>
    %145 = tpu.matmul %143, %144, %cst_52 {dimension_numbers = #tpu.dot_dimension_numbers<[2], [2], [1], [1], [0, 0, 0, 1, 1, 1], [0], [0]>} : vector<2x8x128xbf16>, vector<2x8x128xbf16>, vector<2x8x8xf32> -> vector<2x8x8xf32>
    "tpu.trace_stop"() : () -> ()
    %cst_53 = arith.constant dense<0xFF800000> : vector<2x8xf32>
    %146 = vector.multi_reduction <maximumf>, %145, %cst_53 [2] : vector<2x8x8xf32> to vector<2x8xf32>
    %147 = vector.shape_cast %146 : vector<2x8xf32> to vector<2x8x1xf32>
    %148 = vector.broadcast %147 : vector<2x8x1xf32> to vector<2x8x8xf32>
    %149 = arith.subf %145, %148 : vector<2x8x8xf32>
    %150 = math.exp %149 : vector<2x8x8xf32>
    %cst_54 = arith.constant dense<0.000000e+00> : vector<2x8xf32>
    %151 = vector.multi_reduction <add>, %150, %cst_54 [2] : vector<2x8x8xf32> to vector<2x8xf32>
    %152 = vector.shape_cast %151 : vector<2x8xf32> to vector<2x8x1xf32>
    %153 = tpu.reciprocal %152 {approx = true} : vector<2x8x1xf32> -> vector<2x8x1xf32>
    %154 = vector.broadcast %153 : vector<2x8x1xf32> to vector<2x8x8xf32>
    %155 = arith.mulf %150, %154 : vector<2x8x8xf32>
    %156 = arith.truncf %155 : vector<2x8x8xf32> to vector<2x8x8xbf16>
    %157 = arith.truncf %142 : vector<2x8x128xf32> to vector<2x8x128xbf16>
    "tpu.trace_start"() <{level = 10 : i32, message = "bqk,bkd->bqd"}> : () -> ()
    %cst_55 = arith.constant dense<0.000000e+00> : vector<2x8x128xf32>
    %158 = tpu.matmul %156, %157, %cst_55 {dimension_numbers = #tpu.dot_dimension_numbers<[2], [1], [1], [2], [0, 0, 0, 1, 1, 2], [0], [0]>} : vector<2x8x8xbf16>, vector<2x8x128xbf16>, vector<2x8x128xf32> -> vector<2x8x128xf32>
    "tpu.trace_stop"() : () -> ()
    %159 = vector.shape_cast %158 : vector<2x8x128xf32> to vector<16x128xf32>
    %160 = arith.truncf %159 : vector<16x128xf32> to vector<16x128xbf16>
    %cst_56 = arith.constant dense<0.000000e+00> : vector<16x128xf32>
    %161 = tpu.matmul %160, %119, %cst_56 {dimension_numbers = #tpu.dot_dimension_numbers<[1], [0], [0], [1], [0, 0, 1, 1], [], []>} : vector<16x128xbf16>, vector<128x128xbf16>, vector<16x128xf32> -> vector<16x128xf32>
    %162 = vector.extract_strided_slice %125 {offsets = [3, 0], sizes = [1, 128], strides = [1, 1]} : vector<16x128xf32> to vector<1x128xf32>
    %163 = vector.broadcast %162 : vector<1x128xf32> to vector<16x128xf32>
    %164 = arith.addf %161, %163 : vector<16x128xf32>
    %165 = arith.addf %115, %164 : vector<16x128xf32>
    %166 = vector.extract_strided_slice %125 {offsets = [4, 0], sizes = [1, 128], strides = [1, 1]} : vector<16x128xf32> to vector<1x128xf32>
    %167 = vector.extract_strided_slice %125 {offsets = [5, 0], sizes = [1, 128], strides = [1, 1]} : vector<16x128xf32> to vector<1x128xf32>
    %cst_57 = arith.constant dense<0.000000e+00> : vector<16xf32>
    %168 = vector.multi_reduction <add>, %165, %cst_57 [1] : vector<16x128xf32> to vector<16xf32>
    %169 = vector.shape_cast %168 : vector<16xf32> to vector<16x1xf32>
    %cst_58 = arith.constant 0.0833333358 : f32
    %170 = vector.broadcast %cst_58 : f32 to vector<16x1xf32>
    %171 = arith.mulf %169, %170 : vector<16x1xf32>
    %172 = vector.broadcast %171 : vector<16x1xf32> to vector<16x128xf32>
    %173 = arith.subf %165, %172 : vector<16x128xf32>
    %cst_59 = arith.constant 0.000000e+00 : f32
    %174 = vector.broadcast %cst_59 : f32 to vector<16x128xf32>
    %175 = arith.select %4, %173, %174 : vector<16x128xi1>, vector<16x128xf32>
    %176 = arith.mulf %175, %175 : vector<16x128xf32>
    %cst_60 = arith.constant dense<0.000000e+00> : vector<16xf32>
    %177 = vector.multi_reduction <add>, %176, %cst_60 [1] : vector<16x128xf32> to vector<16xf32>
    %178 = vector.shape_cast %177 : vector<16xf32> to vector<16x1xf32>
    %cst_61 = arith.constant 0.0833333358 : f32
    %179 = vector.broadcast %cst_61 : f32 to vector<16x1xf32>
    %180 = arith.mulf %178, %179 : vector<16x1xf32>
    %cst_62 = arith.constant 9.99999974E-6 : f32
    %181 = vector.broadcast %cst_62 : f32 to vector<16x1xf32>
    %182 = arith.addf %180, %181 : vector<16x1xf32>
    %183 = math.rsqrt %182 : vector<16x1xf32>
    %184 = vector.broadcast %183 : vector<16x1xf32> to vector<16x128xf32>
    %185 = arith.mulf %175, %184 : vector<16x128xf32>
    %186 = vector.broadcast %166 : vector<1x128xf32> to vector<16x128xf32>
    %187 = arith.mulf %185, %186 : vector<16x128xf32>
    %188 = vector.broadcast %167 : vector<1x128xf32> to vector<16x128xf32>
    %189 = arith.addf %187, %188 : vector<16x128xf32>
    %190 = arith.truncf %189 : vector<16x128xf32> to vector<16x128xbf16>
    %cst_63 = arith.constant dense<0.000000e+00> : vector<16x128xf32>
    %191 = tpu.matmul %190, %121, %cst_63 {dimension_numbers = #tpu.dot_dimension_numbers<[1], [0], [0], [1], [0, 0, 1, 1], [], []>} : vector<16x128xbf16>, vector<128x128xbf16>, vector<16x128xf32> -> vector<16x128xf32>
    %192 = vector.extract_strided_slice %125 {offsets = [6, 0], sizes = [1, 128], strides = [1, 1]} : vector<16x128xf32> to vector<1x128xf32>
    %193 = vector.broadcast %192 : vector<1x128xf32> to vector<16x128xf32>
    %194 = arith.addf %191, %193 : vector<16x128xf32>
    %cst_64 = arith.constant 0.000000e+00 : f32
    %195 = vector.broadcast %cst_64 : f32 to vector<16x128xf32>
    %196 = arith.maximumf %194, %195 : vector<16x128xf32>
    %197 = arith.truncf %196 : vector<16x128xf32> to vector<16x128xbf16>
    %cst_65 = arith.constant dense<0.000000e+00> : vector<16x128xf32>
    %198 = tpu.matmul %197, %123, %cst_65 {dimension_numbers = #tpu.dot_dimension_numbers<[1], [0], [0], [1], [0, 0, 1, 1], [], []>} : vector<16x128xbf16>, vector<128x128xbf16>, vector<16x128xf32> -> vector<16x128xf32>
    %199 = vector.extract_strided_slice %125 {offsets = [7, 0], sizes = [1, 128], strides = [1, 1]} : vector<16x128xf32> to vector<1x128xf32>
    %200 = vector.broadcast %199 : vector<1x128xf32> to vector<16x128xf32>
    %201 = arith.addf %198, %200 : vector<16x128xf32>
    %202 = arith.addf %189, %201 : vector<16x128xf32>
    %203 = vector.extract_strided_slice %125 {offsets = [8, 0], sizes = [1, 128], strides = [1, 1]} : vector<16x128xf32> to vector<1x128xf32>
    %204 = vector.extract_strided_slice %125 {offsets = [9, 0], sizes = [1, 128], strides = [1, 1]} : vector<16x128xf32> to vector<1x128xf32>
    %cst_66 = arith.constant dense<0.000000e+00> : vector<16xf32>
    %205 = vector.multi_reduction <add>, %202, %cst_66 [1] : vector<16x128xf32> to vector<16xf32>
    %206 = vector.shape_cast %205 : vector<16xf32> to vector<16x1xf32>
    %cst_67 = arith.constant 0.0833333358 : f32
    %207 = vector.broadcast %cst_67 : f32 to vector<16x1xf32>
    %208 = arith.mulf %206, %207 : vector<16x1xf32>
    %209 = vector.broadcast %208 : vector<16x1xf32> to vector<16x128xf32>
    %210 = arith.subf %202, %209 : vector<16x128xf32>
    %cst_68 = arith.constant 0.000000e+00 : f32
    %211 = vector.broadcast %cst_68 : f32 to vector<16x128xf32>
    %212 = arith.select %4, %210, %211 : vector<16x128xi1>, vector<16x128xf32>
    %213 = arith.mulf %212, %212 : vector<16x128xf32>
    %cst_69 = arith.constant dense<0.000000e+00> : vector<16xf32>
    %214 = vector.multi_reduction <add>, %213, %cst_69 [1] : vector<16x128xf32> to vector<16xf32>
    %215 = vector.shape_cast %214 : vector<16xf32> to vector<16x1xf32>
    %cst_70 = arith.constant 0.0833333358 : f32
    %216 = vector.broadcast %cst_70 : f32 to vector<16x1xf32>
    %217 = arith.mulf %215, %216 : vector<16x1xf32>
    %cst_71 = arith.constant 9.99999974E-6 : f32
    %218 = vector.broadcast %cst_71 : f32 to vector<16x1xf32>
    %219 = arith.addf %217, %218 : vector<16x1xf32>
    %220 = math.rsqrt %219 : vector<16x1xf32>
    %221 = vector.broadcast %220 : vector<16x1xf32> to vector<16x128xf32>
    %222 = arith.mulf %212, %221 : vector<16x128xf32>
    %223 = vector.broadcast %203 : vector<1x128xf32> to vector<16x128xf32>
    %224 = arith.mulf %222, %223 : vector<16x128xf32>
    %225 = vector.broadcast %204 : vector<1x128xf32> to vector<16x128xf32>
    %226 = arith.addf %224, %225 : vector<16x128xf32>
    %c0_72 = arith.constant 0 : index
    %c0_73 = arith.constant 0 : index
    %227 = vector.load %arg10[%c0_72, %c0_73] : memref<8x128xf32, #tpu.memory_space<vmem>>, vector<8x128xf32>
    %228 = vector.shape_cast %0 : vector<2x8x128xf32> to vector<16x128xf32>
    %229 = arith.truncf %228 : vector<16x128xf32> to vector<16x128xbf16>
    %c0_74 = arith.constant 0 : index
    %c0_75 = arith.constant 0 : index
    %230 = vector.load %arg7[%c0_74, %c0_75] : memref<128x128xbf16, #tpu.memory_space<vmem>>, vector<128x128xbf16>
    %cst_76 = arith.constant dense<0.000000e+00> : vector<16x128xf32>
    %231 = tpu.matmul %229, %230, %cst_76 {dimension_numbers = #tpu.dot_dimension_numbers<[1], [0], [0], [1], [0, 0, 1, 1], [], []>} : vector<16x128xbf16>, vector<128x128xbf16>, vector<16x128xf32> -> vector<16x128xf32>
    %232 = vector.extract_strided_slice %227 {offsets = [0, 0], sizes = [1, 128], strides = [1, 1]} : vector<8x128xf32> to vector<1x128xf32>
    %233 = vector.broadcast %232 : vector<1x128xf32> to vector<16x128xf32>
    %234 = arith.addf %231, %233 : vector<16x128xf32>
    %235 = vector.shape_cast %234 : vector<16x128xf32> to vector<2x8x128xf32>
    %236 = arith.truncf %226 : vector<16x128xf32> to vector<16x128xbf16>
    %c0_77 = arith.constant 0 : index
    %c0_78 = arith.constant 0 : index
    %237 = vector.load %arg8[%c0_77, %c0_78] : memref<128x256xbf16, #tpu.memory_space<vmem>>, vector<128x256xbf16>
    %cst_79 = arith.constant dense<0.000000e+00> : vector<16x256xf32>
    %238 = tpu.matmul %236, %237, %cst_79 {dimension_numbers = #tpu.dot_dimension_numbers<[1], [0], [0], [1], [0, 0, 1, 1], [], []>} : vector<16x128xbf16>, vector<128x256xbf16>, vector<16x256xf32> -> vector<16x256xf32>
    %239 = vector.extract_strided_slice %238 {offsets = [0, 0], sizes = [16, 128], strides = [1, 1]} : vector<16x256xf32> to vector<16x128xf32>
    %240 = vector.extract_strided_slice %227 {offsets = [1, 0], sizes = [1, 128], strides = [1, 1]} : vector<8x128xf32> to vector<1x128xf32>
    %241 = vector.broadcast %240 : vector<1x128xf32> to vector<16x128xf32>
    %242 = arith.addf %239, %241 : vector<16x128xf32>
    %243 = vector.shape_cast %242 : vector<16x128xf32> to vector<2x8x128xf32>
    %244 = vector.extract_strided_slice %238 {offsets = [0, 128], sizes = [16, 128], strides = [1, 1]} : vector<16x256xf32> to vector<16x128xf32>
    %245 = vector.extract_strided_slice %227 {offsets = [2, 0], sizes = [1, 128], strides = [1, 1]} : vector<8x128xf32> to vector<1x128xf32>
    %246 = vector.broadcast %245 : vector<1x128xf32> to vector<16x128xf32>
    %247 = arith.addf %244, %246 : vector<16x128xf32>
    %248 = vector.shape_cast %247 : vector<16x128xf32> to vector<2x8x128xf32>
    %249 = arith.truncf %235 : vector<2x8x128xf32> to vector<2x8x128xbf16>
    %250 = arith.truncf %243 : vector<2x8x128xf32> to vector<2x8x128xbf16>
    "tpu.trace_start"() <{level = 10 : i32, message = "bqd,bkd->bqk"}> : () -> ()
    %cst_80 = arith.constant dense<0.000000e+00> : vector<2x8x8xf32>
    %251 = tpu.matmul %249, %250, %cst_80 {dimension_numbers = #tpu.dot_dimension_numbers<[2], [2], [1], [1], [0, 0, 0, 1, 1, 1], [0], [0]>} : vector<2x8x128xbf16>, vector<2x8x128xbf16>, vector<2x8x8xf32> -> vector<2x8x8xf32>
    "tpu.trace_stop"() : () -> ()
    %cst_81 = arith.constant dense<0xFF800000> : vector<2x8xf32>
    %252 = vector.multi_reduction <maximumf>, %251, %cst_81 [2] : vector<2x8x8xf32> to vector<2x8xf32>
    %253 = vector.shape_cast %252 : vector<2x8xf32> to vector<2x8x1xf32>
    %254 = vector.broadcast %253 : vector<2x8x1xf32> to vector<2x8x8xf32>
    %255 = arith.subf %251, %254 : vector<2x8x8xf32>
    %256 = math.exp %255 : vector<2x8x8xf32>
    %cst_82 = arith.constant dense<0.000000e+00> : vector<2x8xf32>
    %257 = vector.multi_reduction <add>, %256, %cst_82 [2] : vector<2x8x8xf32> to vector<2x8xf32>
    %258 = vector.shape_cast %257 : vector<2x8xf32> to vector<2x8x1xf32>
    %259 = tpu.reciprocal %258 {approx = true} : vector<2x8x1xf32> -> vector<2x8x1xf32>
    %260 = vector.broadcast %259 : vector<2x8x1xf32> to vector<2x8x8xf32>
    %261 = arith.mulf %256, %260 : vector<2x8x8xf32>
    %262 = arith.truncf %261 : vector<2x8x8xf32> to vector<2x8x8xbf16>
    %263 = arith.truncf %248 : vector<2x8x128xf32> to vector<2x8x128xbf16>
    "tpu.trace_start"() <{level = 10 : i32, message = "bqk,bkd->bqd"}> : () -> ()
    %cst_83 = arith.constant dense<0.000000e+00> : vector<2x8x128xf32>
    %264 = tpu.matmul %262, %263, %cst_83 {dimension_numbers = #tpu.dot_dimension_numbers<[2], [1], [1], [2], [0, 0, 0, 1, 1, 2], [0], [0]>} : vector<2x8x8xbf16>, vector<2x8x128xbf16>, vector<2x8x128xf32> -> vector<2x8x128xf32>
    "tpu.trace_stop"() : () -> ()
    %265 = vector.shape_cast %264 : vector<2x8x128xf32> to vector<16x128xf32>
    %266 = arith.truncf %265 : vector<16x128xf32> to vector<16x128xbf16>
    %c0_84 = arith.constant 0 : index
    %c0_85 = arith.constant 0 : index
    %267 = vector.load %arg9[%c0_84, %c0_85] : memref<128x128xbf16, #tpu.memory_space<vmem>>, vector<128x128xbf16>
    %cst_86 = arith.constant dense<0.000000e+00> : vector<16x128xf32>
    %268 = tpu.matmul %266, %267, %cst_86 {dimension_numbers = #tpu.dot_dimension_numbers<[1], [0], [0], [1], [0, 0, 1, 1], [], []>} : vector<16x128xbf16>, vector<128x128xbf16>, vector<16x128xf32> -> vector<16x128xf32>
    %269 = vector.extract_strided_slice %227 {offsets = [3, 0], sizes = [1, 128], strides = [1, 1]} : vector<8x128xf32> to vector<1x128xf32>
    %270 = vector.broadcast %269 : vector<1x128xf32> to vector<16x128xf32>
    %271 = arith.addf %268, %270 : vector<16x128xf32>
    %272 = vector.shape_cast %271 : vector<16x128xf32> to vector<2x8x128xf32>
    %c0_87 = arith.constant 0 : index
    %c0_88 = arith.constant 0 : index
    %c0_89 = arith.constant 0 : index
    %273 = vector.load %arg11[%c0_87, %c0_88, %c0_89] : memref<2x8x128xf32, #tpu.memory_space<vmem>>, vector<2x8x128xf32>
    tpu.vector_store %arg11[%c0_87, %c0_88, %c0_89], %272 {strides = array<i32>} : memref<2x8x128xf32, #tpu.memory_space<vmem>>, vector<2x8x128xf32>,
    return
  }
  func.func @transform_0(%arg0: i32) -> (i32, i32, i32) {
    %c0_i32 = arith.constant 0 : i32
    %c0_i32_0 = arith.constant 0 : i32
    %c0_i32_1 = arith.constant 0 : i32
    return %arg0, %c0_i32, %c0_i32_0 : i32, i32, i32
  }
  func.func @transform_1(%arg0: i32) -> (i32, i32, i32) {
    %c0_i32 = arith.constant 0 : i32
    %c0_i32_0 = arith.constant 0 : i32
    %c0_i32_1 = arith.constant 0 : i32
    %c0_i32_2 = arith.constant 0 : i32
    return %c0_i32, %c0_i32_0, %c0_i32_1 : i32, i32, i32
  }
  func.func @transform_2(%arg0: i32) -> (i32, i32, i32) {
    %c0_i32 = arith.constant 0 : i32
    %c0_i32_0 = arith.constant 0 : i32
    %c0_i32_1 = arith.constant 0 : i32
    %c0_i32_2 = arith.constant 0 : i32
    return %c0_i32, %c0_i32_0, %c0_i32_1 : i32, i32, i32
  }
  func.func @transform_3(%arg0: i32) -> (i32, i32, i32) {
    %c0_i32 = arith.constant 0 : i32
    %c0_i32_0 = arith.constant 0 : i32
    %c0_i32_1 = arith.constant 0 : i32
    %c0_i32_2 = arith.constant 0 : i32
    return %c0_i32, %c0_i32_0, %c0_i32_1 : i32, i32, i32
  }
  func.func @transform_4(%arg0: i32) -> (i32, i32, i32) {
    %c0_i32 = arith.constant 0 : i32
    %c0_i32_0 = arith.constant 0 : i32
    %c0_i32_1 = arith.constant 0 : i32
    %c0_i32_2 = arith.constant 0 : i32
    return %c0_i32, %c0_i32_0, %c0_i32_1 : i32, i32, i32
  }
  func.func @transform_5(%arg0: i32) -> (i32, i32, i32) {
    %c0_i32 = arith.constant 0 : i32
    %c0_i32_0 = arith.constant 0 : i32
    %c0_i32_1 = arith.constant 0 : i32
    %c0_i32_2 = arith.constant 0 : i32
    return %c0_i32, %c0_i32_0, %c0_i32_1 : i32, i32, i32
  }
  func.func @transform_6(%arg0: i32) -> (i32, i32) {
    %c0_i32 = arith.constant 0 : i32
    %c0_i32_0 = arith.constant 0 : i32
    %c0_i32_1 = arith.constant 0 : i32
    return %c0_i32, %c0_i32_0 : i32, i32
  }
  func.func @transform_7(%arg0: i32) -> (i32, i32) {
    %c0_i32 = arith.constant 0 : i32
    %c0_i32_0 = arith.constant 0 : i32
    %c0_i32_1 = arith.constant 0 : i32
    return %c0_i32, %c0_i32_0 : i32, i32
  }
  func.func @transform_8(%arg0: i32) -> (i32, i32) {
    %c0_i32 = arith.constant 0 : i32
    %c0_i32_0 = arith.constant 0 : i32
    %c0_i32_1 = arith.constant 0 : i32
    return %c0_i32, %c0_i32_0 : i32, i32
  }
  func.func @transform_9(%arg0: i32) -> (i32, i32) {
    %c0_i32 = arith.constant 0 : i32
    %c0_i32_0 = arith.constant 0 : i32
    %c0_i32_1 = arith.constant 0 : i32
    return %c0_i32, %c0_i32_0 : i32, i32
  }
  func.func @transform_10(%arg0: i32) -> (i32, i32, i32) {
    %c0_i32 = arith.constant 0 : i32
    %c0_i32_0 = arith.constant 0 : i32
    %c0_i32_1 = arith.constant 0 : i32
    return %arg0, %c0_i32, %c0_i32_0 : i32, i32, i32
  }
}

</mosaic_0001>

<bundles_post_ra>
// kernel: tpu_custom_call.1
= control target key start
LH: loop header
LB: loop body
LE: loop exit
PB: predicated region body
PF: predicated region fallthrough
CT: control target
= control target key end

     0   :  { %15 = vsyncpa [#allocation3], 0  ;;  %s3900_s0 = inlined_call_operand.hbm [shape: f32[2,8,128], index: 0, kind: input, shape index: {}]   ;;  %s3901_s1 = inlined_call_operand.hbm [shape: bf16[2,128,384], index: 1, kind: input, shape index: {}]   ;;  %s3902_s2 = inlined_call_operand.hbm [shape: bf16[2,128,128], index: 2, kind: input, shape index: {}]   ;;  %s3903_s3 = inlined_call_operand.hbm [shape: bf16[2,128,128], index: 3, kind: input, shape index: {}]   ;;  %s3904_s4 = inlined_call_operand.hbm [shape: bf16[2,128,128], index: 4, kind: input, shape index: {}]   ;;  %s3905_s5 = inlined_call_operand.hbm [shape: f32[2,16,128], index: 5, kind: input, shape index: {}]   ;;  %s3906_s6 = inlined_call_operand.hbm [shape: bf16[128,128], index: 6, kind: input, shape index: {}]   ;;  %s3907_s7 = inlined_call_operand.hbm [shape: bf16[128,256], index: 7, kind: input, shape index: {}]   ;;  %s3908_s8 = inlined_call_operand.hbm [shape: bf16[128,128], index: 8, kind: input, shape index: {}]   ;;  %s3909_s9 = inlined_call_operand.vmem [shape: f32[8,128], index: 9, kind: input, shape index: {}]   ;;  %s3910_s10 = inlined_call_operand.hbm [shape: f32[2,8,128], index: 10, kind: output, shape index: {}]  }
   0x1   :  { %16 = vsyncpa [#allocation6], 0 }
   0x2   :  { %17 = vsyncpa [#allocation9], 0 }
   0x3   :  { %18 = vsyncpa [#allocation12], 0 }
   0x4   :  { %19 = vsyncpa [#allocation15], 0 }
   0x5   :  { %20 = vsyncpa [#allocation4], 0  ;;  %s3461_s13 = smov [#allocation5]  }
   0x6   :  { %s38_s14 = sshll.u32 %s3461_s13, 4  ;;  %s39_s14 = int_to_ptr.vmem [resolvable:$true] %s38_s14 }
   0x7   :  { %s3257_s15 = scalar_lea.vmem %s39_s14, 6144  ;;  %p3262_p1 = scmp.lt.s32.totalorder %s39_s14, %s39_s14 }
   0x8   :  { %p3258_p0 = scmp.ne.s32.totalorder %s39_s14, %s3257_s15  ;;  %p3263_p2 = scmp.lt.s32.totalorder %s3257_s15, %s3257_s15 }
   0xa   :  { %p3264_p3 = por %p3263_p2, %p3262_p1 }
   0xc   :  { %p3265_p4 = pnand %p3264_p3, %p3258_p0 }
   0xe   :  { %3268 = shalt.err (!%p3265_p4)
}
   0xf   :  { %s3462_s16 = smov 192   ;;  %s3463_s17 = smov 12  }
  0x10   :  { %44 = dma.hbm_to_vmem [thread:$0]  %s3901_s1, 6144, %s39_s14, [#allocation6], %s3462_s16, %s3462_s16, %s3463_s17  }
  0x11   :  { %s3464_s20 = smov [#allocation8]  }
  0x12   :  { %s62_s21 = sshll.u32 %s3464_s20, 4  ;;  %s63_s21 = int_to_ptr.vmem [resolvable:$true] %s62_s21 }
  0x13   :  { %s3277_s22 = scalar_lea.vmem %s63_s21, 2048  ;;  %p3282_p6 = scmp.lt.s32.totalorder %s63_s21, %s63_s21 }
  0x14   :  { %p3278_p5 = scmp.ne.s32.totalorder %s63_s21, %s3277_s22  ;;  %p3283_p7 = scmp.lt.s32.totalorder %s3277_s22, %s3277_s22 }
  0x16   :  { %p3284_p8 = por %p3283_p7, %p3282_p6 }
  0x18   :  { %p3285_p9 = pnand %p3284_p8, %p3278_p5 }
  0x1a   :  { %3288 = shalt.err (!%p3285_p9)
}
  0x1b   :  { %s3465_s23 = smov 64   ;;  %s3466_s24 = smov 4  }
  0x1c   :  { %68 = dma.hbm_to_vmem [thread:$0]  %s3903_s3, 2048, %s63_s21, [#allocation9], %s3465_s23, %s3465_s23, %s3466_s24  }
  0x1d   :  { %s3467_s1 = smov [#allocation11]   ;;  %s3468_s28 = smov [#allocation14]  }
  0x1e   :  { %s86_s27 = sshll.u32 %s3467_s1, 4  ;;  %s110_s29 = sshll.u32 %s3468_s28, 4  ;;  %s87_s27 = int_to_ptr.vmem [resolvable:$true] %s86_s27  ;;  %s111_s29 = int_to_ptr.vmem [resolvable:$true] %s110_s29 }
  0x1f   :  { %s3297_s30 = scalar_lea.vmem %s87_s27, 512  ;;  %p3302_p11 = scmp.lt.s32.totalorder %s87_s27, %s87_s27 }
  0x20   :  { %p3298_p10 = scmp.ne.s32.totalorder %s87_s27, %s3297_s30  ;;  %p3303_p12 = scmp.lt.s32.totalorder %s3297_s30, %s3297_s30 }
  0x22   :  { %p3304_p13 = por %p3303_p12, %p3302_p11 }
  0x24   :  { %p3305_p0 = pnand %p3304_p13, %p3298_p10 }
  0x26   :  { %3308 = shalt.err (!%p3305_p0)
}
  0x27   :  { %s3469_s11 = smov 128   ;;  %s3470_s12 = smov 8  }
  0x28   :  { %92 = dma.hbm_to_vmem [thread:$0]  %s3905_s5, 512, %s87_s27, [#allocation12], %s3469_s11, %s3469_s11, %s3470_s12  }
  0x29   :  { %s3317_s14 = scalar_lea.vmem %s111_s29, 2048  ;;  %p3322_p2 = scmp.lt.s32.totalorder %s111_s29, %s111_s29 }
  0x2a   :  { %p3318_p1 = scmp.ne.s32.totalorder %s111_s29, %s3317_s14  ;;  %p3323_p3 = scmp.lt.s32.totalorder %s3317_s14, %s3317_s14 }
  0x2c   :  { %p3324_p4 = por %p3323_p3, %p3322_p2 }
  0x2e   :  { %p3325_p5 = pnand %p3324_p4, %p3318_p1 }
  0x30   :  { %3328 = shalt.err (!%p3325_p5)
}
  0x31   :  { %116 = dma.hbm_to_vmem [thread:$0]  %s3907_s7, 2048, %s111_s29, [#allocation15], %s3469_s11, %s3469_s11, %s3470_s12  }
  0x32   :  { %s3471_s17 = smov [#allocation2]   ;;  %s3472_s19 = smov [#allocation7]  }
  0x33   :  { %s26_s18 = sshll.u32 %s3471_s17, 4  ;;  %s50_s20 = sshll.u32 %s3472_s19, 4  ;;  %s27_s18 = int_to_ptr.vmem [resolvable:$true] %s26_s18  ;;  %s51_s20 = int_to_ptr.vmem [resolvable:$true] %s50_s20 }
  0x34   :  { %s3337_s5 = scalar_lea.vmem %s27_s18, 256  ;;  %p3342_p7 = scmp.lt.s32.totalorder %s27_s18, %s27_s18 }
  0x35   :  { %p3338_p6 = scmp.ne.s32.totalorder %s27_s18, %s3337_s5  ;;  %p3343_p8 = scmp.lt.s32.totalorder %s3337_s5, %s3337_s5 }
  0x37   :  { %p3344_p9 = por %p3343_p8, %p3342_p7 }
  0x39   :  { %p3345_p10 = pnand %p3344_p9, %p3338_p6 }
  0x3b   :  { %3348 = shalt.err (!%p3345_p10)
}
  0x3c   :  { %32 = dma.hbm_to_vmem [thread:$0]  %s3900_s0, 256, %s27_s18, [#allocation3], %s3469_s11, %s3469_s11, %s3470_s12  }
  0x3d   :  { %s3357_s7 = scalar_lea.vmem %s51_s20, 2048  ;;  %p3362_p12 = scmp.lt.s32.totalorder %s51_s20, %s51_s20 }
  0x3e   :  { %p3358_p11 = scmp.ne.s32.totalorder %s51_s20, %s3357_s7  ;;  %p3363_p13 = scmp.lt.s32.totalorder %s3357_s7, %s3357_s7 }
  0x40   :  { %p3364_p0 = por %p3363_p13, %p3362_p12 }
  0x42   :  { %p3365_p1 = pnand %p3364_p0, %p3358_p11 }
  0x44   :  { %3368 = shalt.err (!%p3365_p1)
}
  0x45   :  { %56 = dma.hbm_to_vmem [thread:$0]  %s3902_s2, 2048, %s51_s20, [#allocation6], %s3465_s23, %s3465_s23, %s3466_s24  }
  0x46   :  { %s3473_s1 = smov [#allocation10]   ;;  %s3474_s28 = smov [#allocation13]  }
  0x47   :  { %s74_s27 = sshll.u32 %s3473_s1, 4  ;;  %s98_s29 = sshll.u32 %s3474_s28, 4  ;;  %s75_s27 = int_to_ptr.vmem [resolvable:$true] %s74_s27  ;;  %s99_s29 = int_to_ptr.vmem [resolvable:$true] %s98_s29 }
  0x48   :  { %s3377_s0 = scalar_lea.vmem %s75_s27, 2048  ;;  %p3382_p3 = scmp.lt.s32.totalorder %s75_s27, %s75_s27 }
  0x49   :  { %p3378_p2 = scmp.ne.s32.totalorder %s75_s27, %s3377_s0  ;;  %p3383_p4 = scmp.lt.s32.totalorder %s3377_s0, %s3377_s0 }
  0x4b   :  { %p3384_p5 = por %p3383_p4, %p3382_p3 }
  0x4d   :  { %p3385_p6 = pnand %p3384_p5, %p3378_p2 }
  0x4f   :  { %3388 = shalt.err (!%p3385_p6)
}
  0x50   :  { %80 = dma.hbm_to_vmem [thread:$0]  %s3904_s4, 2048, %s75_s27, [#allocation9], %s3465_s23, %s3465_s23, %s3466_s24  }
  0x51   :  { %s3397_s2 = scalar_lea.vmem %s99_s29, 1024  ;;  %p3402_p8 = scmp.lt.s32.totalorder %s99_s29, %s99_s29 }
  0x52   :  { %p3398_p7 = scmp.ne.s32.totalorder %s99_s29, %s3397_s2  ;;  %p3403_p9 = scmp.lt.s32.totalorder %s3397_s2, %s3397_s2 }
  0x54   :  { %p3404_p10 = por %p3403_p9, %p3402_p8 }
  0x56   :  { %p3405_p11 = pnand %p3404_p10, %p3398_p7 }
  0x58   :  { %3408 = shalt.err (!%p3405_p11)
}
  0x59   :  { %104 = dma.hbm_to_vmem [thread:$0]  %s3906_s6, 1024, %s99_s29, [#allocation12], %s3465_s23, %s3465_s23, %s3466_s24  }
  0x5a   :  { %s3475_s15 = smov [#allocation16]  }
  0x5b   :  { %s122_s16 = sshll.u32 %s3475_s15, 4  ;;  %s123_s16 = int_to_ptr.vmem [resolvable:$true] %s122_s16 }
  0x5c   :  { %s3417_s17 = scalar_lea.vmem %s123_s16, 1024  ;;  %p3422_p13 = scmp.lt.s32.totalorder %s123_s16, %s123_s16 }
  0x5d   :  { %p3418_p12 = scmp.ne.s32.totalorder %s123_s16, %s3417_s17  ;;  %p3423_p0 = scmp.lt.s32.totalorder %s3417_s17, %s3417_s17 }
  0x5f   :  { %p3424_p1 = por %p3423_p0, %p3422_p13 }
  0x61   :  { %p3425_p2 = pnand %p3424_p1, %p3418_p12 }
  0x63   :  { %3428 = shalt.err (!%p3425_p2)
}
  0x64   :  { %128 = dma.hbm_to_vmem [thread:$0]  %s3908_s8, 1024, %s123_s16, [#allocation15], %s3465_s23, %s3465_s23, %s3466_s24  }
  0x65   :  { %3449 = dma.done.wait [#allocation3], 256  }
  0x66   :  { %3450 = vsyncadd [#allocation3], 4294967040 }
  0x67   :  { %3451 = dma.done.wait [#allocation6], 8192  }
  0x68   :  { %3452 = vsyncadd [#allocation6], 4294959104 }
  0x69   :  { %3453 = dma.done.wait [#allocation9], 4096  }
  0x6a   :  { %3454 = vsyncadd [#allocation9], 4294963200 }
  0x6b   :  { %3455 = dma.done.wait [#allocation12], 1536  }
  0x6c   :  { %3456 = vsyncadd [#allocation12], 4294965760 }
  0x6d   :  { %3457 = dma.done.wait [#allocation15], 3072  }
  0x6e   :  { %3458 = vsyncadd [#allocation15], 4294964224  ;;  %v3476_v0 = vmov 0   ;;  %v3477_v1 = vmov 0.0   ;;  %vm3478_vm0 = vmmov 0   ;;  %v3593_v23 = vld [vmem:[#allocation2] sm:$0xff]  ;;  %v161_v29 = vlaneseq }
  0x6f   :  { %407 = vmatprep.mubr.bf16.mxu0 %v3476_v0  ;;  %2766 = vmatprep.subr.bf16.mxu1 %v3477_v1  ;;  %v3057_v2 = vld [vmem:[#allocation5 + $0xac] ss:$12 sps:$4 sm:$0xff]   ;;  %v3059_v3 = vld [vmem:[#allocation5 + $0xa8] ss:$12 sps:$4 sm:$0xff]   ;;  %v3062_v5 = vld [vmem:[#allocation5 + $0x90] ss:$12 sps:$4 sm:$0xff]  }
  0x70   :  { %2782 = vmatprep.mubr.msk.bf16.mxu1 %vm3478_vm0, %v3477_v1  ;;  %375 = vmatprep.subr.bf16.mxu0 %v3057_v2  ;;  %v3060_v4 = vld [vmem:[#allocation5 + $0x94] ss:$12 sps:$4 sm:$0xff]   ;;  %v3063_v6 = vld [vmem:[#allocation5 + $0x7c] ss:$12 sps:$4 sm:$0xff]   ;;  %v3065_v7 = vld [vmem:[#allocation5 + $0x78] ss:$12 sps:$4 sm:$0xff]  }
  0x71   :  { %376 = vmatpush1.bf16.msra.mxu0 %v3059_v3  ;;  %v3066_v8 = vld [vmem:[#allocation5 + $0x64] ss:$12 sps:$4 sm:$0xff]   ;;  %v3068_v9 = vld [vmem:[#allocation5 + $0x60] ss:$12 sps:$4 sm:$0xff]   ;;  %v3071_v13 = vld [vmem:[#allocation5 + $0x48] ss:$12 sps:$4 sm:$0xff]  }
  0x72   :  { %377 = vmatprep.subr.bf16.mxu0 %v3060_v4  ;;  %v3069_v10 = vld [vmem:[#allocation5 + $0x4c] ss:$12 sps:$4 sm:$0xff]   ;;  %v3081_v11 = vld [vmem:[#allocation5 + $0xb0] ss:$12 sps:$4 sm:$0xff]   ;;  %v3072_v14 = vld [vmem:[#allocation5 + $0x34] ss:$12 sps:$4 sm:$0xff]  }
  0x73   :  { %2767 = vmatpush3.bf16.msra.mxu1 %v3081_v11  ;;  %v3082_v12 = vld [vmem:[#allocation5 + $0x98] ss:$12 sps:$4 sm:$0xff]   ;;  %v3083_v15 = vld [vmem:[#allocation5 + $0x80] ss:$12 sps:$4 sm:$0xff]   ;;  %v3074_v16 = vld [vmem:[#allocation5 + $0x30] ss:$12 sps:$4 sm:$0xff]  }
  0x74   :  { %2768 = vmatprep.subr.bf16.mxu1 %v3477_v1  ;;  %v3075_v17 = vld [vmem:[#allocation5 + $0x1c] ss:$12 sps:$4 sm:$0xff]   ;;  %v3077_v19 = vld [vmem:[#allocation5 + $0x18] ss:$12 sps:$4 sm:$0xff]   ;;  %v3080_v22 = vld [vmem:[#allocation5] ss:$12 sps:$4 sm:$0xff]  }
  0x75   :  { %378 = vmatpush1.bf16.msra.mxu0 %v3062_v5  ;;  %v3084_v18 = vld [vmem:[#allocation5 + $0x68] ss:$12 sps:$4 sm:$0xff]   ;;  %v3078_v20 = vld [vmem:[#allocation5 + $0x4] ss:$12 sps:$4 sm:$0xff]   ;;  %v3595_v24 = vld [vmem:[#allocation2 + $0x8] sm:$0xff]  ;;  %v3614_v30 = vshrl.u32 %v161_v29, 7 }
  0x76   :  { %379 = vmatprep.subr.bf16.mxu0 %v3063_v6  ;;  %v3085_v21 = vld [vmem:[#allocation5 + $0x50] ss:$12 sps:$4 sm:$0xff]   ;;  %v3086_v25 = vld [vmem:[#allocation5 + $0x38] ss:$12 sps:$4 sm:$0xff]   ;;  %v3600_v26 = vpack.c.bf16 %v3595_v24, %v3593_v23  ;;  %v3087_v27 = vld [vmem:[#allocation5 + $0x20] ss:$12 sps:$4 sm:$0xff]  }
  0x77   :  { %2769 = vmatpush3.bf16.msra.mxu1 %v3082_v12  ;;  %v3088_v28 = vld [vmem:[#allocation5 + $0x8] ss:$12 sps:$4 sm:$0xff]   ;;  %v3617_v31 = vsub.s32 1, %v3614_v30  ;;  %v3619_v32 = vld [vmem:[#allocation11] sm:$0xff]  ;;  %v3624_v35 = vsub.s32 0, %v3614_v30  ;;  %v3629_v40 = vsub.s32 2, %v3614_v30 }
  0x78   :  { %2770 = vmatprep.subr.bf16.mxu1 %v3477_v1  ;;  %vm591_vm1 = vcmask 1043456   ;;  %vm561_vm2 = vcmask 64512  }
  0x79   :  { %380 = vmatpush1.bf16.msra.mxu0 %v3065_v7  ;;  %v468_v33 = vrot.slane %v3619_v32, %v3617_v31  ;;  %v462_v38 = vrot.slane %v3619_v32, %v3624_v35  ;;  %v474_v44 = vrot.slane %v3619_v32, %v3629_v40 }
  0x7a   :  { %381 = vmatprep.subr.bf16.mxu0 %v3066_v8 }
  0x7b   :  { %2771 = vmatpush3.bf16.msra.mxu1 %v3083_v15 }
  0x7c   :  { %2772 = vmatprep.subr.bf16.mxu1 %v3477_v1 }
  0x7d   :  { %382 = vmatpush1.bf16.msra.mxu0 %v3068_v9 }
  0x7e   :  { %383 = vmatprep.subr.bf16.mxu0 %v3069_v10 }
  0x7f   :  { %2773 = vmatpush3.bf16.msra.mxu1 %v3084_v18  ;;  %v3091_v18 = vld [vmem:[#allocation7 + $0x28] sm:$0xff]  }
  0x80   :  { %2774 = vmatprep.subr.bf16.mxu1 %v3477_v1 }
  0x81   :  { %384 = vmatpush1.bf16.msra.mxu0 %v3071_v13 }
  0x82   :  { %385 = vmatprep.subr.bf16.mxu0 %v3072_v14 }
  0x83   :  { %2775 = vmatpush3.bf16.msra.mxu1 %v3085_v21 }
  0x84   :  { %2776 = vmatprep.subr.bf16.mxu1 %v3477_v1 }
  0x85   :  { %386 = vmatpush1.bf16.msra.mxu0 %v3074_v16  ;;  %v3089_v16 = vld [vmem:[#allocation7 + $0x38] sm:$0xff]  }
  0x86   :  { %387 = vmatprep.subr.bf16.mxu0 %v3075_v17  ;;  %v3090_v17 = vld [vmem:[#allocation7 + $0x30] sm:$0xff]  }
  0x87   :  { %2777 = vmatpush3.bf16.msra.mxu1 %v3086_v25 }
  0x88   :  { %2778 = vmatprep.subr.bf16.mxu1 %v3477_v1 }
  0x89   :  { %388 = vmatpush1.bf16.msra.mxu0 %v3077_v19  ;;  %v3092_v19 = vld [vmem:[#allocation7 + $0x20] sm:$0xff]  }
  0x8a   :  { %389 = vmatprep.subr.bf16.mxu0 %v3078_v20  ;;  %v3093_v20 = vld [vmem:[#allocation7 + $0x18] sm:$0xff]  }
  0x8b   :  { %2779 = vmatpush3.bf16.msra.mxu1 %v3087_v27 }
  0x8c   :  { %2780 = vmatprep.subr.bf16.mxu1 %v3477_v1 }
  0x8d   :  { %390 = vmatpush1.bf16.msra.mxu0 %v3080_v22 }
  0x8e   :  { %2810 = vmatprep.subr.bf16.mxu0 %v3477_v1 }
  0x8f   :  { %2781 = vmatpush3.bf16.msra.mxu1 %v3088_v28 }
  0x90   :  { %408 = vmatmul.mubr.bf16.vlgmr.msra.gmra.mxu0 %v3600_v26  ;;  %2786 = vmatprep.subr.bf16.mxu1 %v3477_v1 }
  0x91   :  { %2826 = vmatprep.mubr.msk.bf16.mxu0 %vm3478_vm0, %v3477_v1  ;;  %2811 = vmatpush3.bf16.msra.mxu0 %v3089_v16  ;;  %v3105_v16 = vld [vmem:[#allocation10 + $0x38] sm:$0xff]  }
  0x92   :  { %2783 = vmatmul.mubr.bf16.vlgmr.msra.gmra.mxu1 %v3600_v26  ;;  %2812 = vmatprep.subr.bf16.mxu0 %v3477_v1 }
  0x93   :  { %2788 = vmatprep.mubr.msk.bf16.mxu1 %vm3478_vm0, %v3477_v1 }
  0x95   :  { %2813 = vmatpush3.bf16.msra.mxu0 %v3090_v17  ;;  %v3106_v17 = vld [vmem:[#allocation10 + $0x30] sm:$0xff]  }
  0x96   :  { %2814 = vmatprep.subr.bf16.mxu0 %v3477_v1 }
  0x99   :  { %2815 = vmatpush3.bf16.msra.mxu0 %v3091_v18  ;;  %v3107_v18 = vld [vmem:[#allocation10 + $0x28] sm:$0xff]  }
  0x9a   :  { %2816 = vmatprep.subr.bf16.mxu0 %v3477_v1 }
  0x9d   :  { %2817 = vmatpush3.bf16.msra.mxu0 %v3092_v19  ;;  %v3108_v19 = vld [vmem:[#allocation10 + $0x20] sm:$0xff]  }
  0x9e   :  { %2818 = vmatprep.subr.bf16.mxu0 %v3477_v1 }
  0xa1   :  { %2819 = vmatpush3.bf16.msra.mxu0 %v3093_v20  ;;  %v3109_v20 = vld [vmem:[#allocation10 + $0x18] sm:$0xff]  }
  0xa2   :  { %2820 = vmatprep.subr.bf16.mxu0 %v3477_v1 }
 0x150   :  { %v409_v34 = vpop.f32.mrf.mxu0 }
 0x151   :  { %v463_v43 = vadd.f32 %v462_v38, %v409_v34 }
 0x152   :  { %v411_v36 = vpop.f32.mrf.mxu0  ;;  %v452_v46 = vpop.f32.mrf.mxu1 }
 0x153   :  { %v469_v37 = vadd.f32 %v468_v33, %v411_v36  ;;  %v477_v47 = vpack.c.bf16 %v463_v43, %v463_v43  ;;  %v475_v48 = vadd.f32 %v474_v44, %v452_v46 }
 0x154   :  { %v413_v39 = vpop.f32.mrf.mxu0  ;;  %v2784_v50 = vpop.f32.mrf.mxu1 }
 0x155   :  { %v479_v41 = vpack.c.bf16 %v469_v37, %v469_v37  ;;  %v464_v52 = vadd.f32 %v462_v38, %v413_v39  ;;  %v586_v53 = vpack.c.bf16 %v475_v48, %v475_v48  ;;  %v3094_v39 = vld [vmem:[#allocation7 + $0x10] sm:$0xff]  }
 0x156   :  { %v415_v42 = vpop.f32.mrf.mxu0  ;;  %v455_v51 = vpop.f32.mrf.mxu1  ;;  %2821 = vmatpush3.bf16.msra.mxu0 %v3094_v39  ;;  %v809_v39 = vsub.s32 5, %v3614_v30 }
 0x157   :  { %2787 = vmatpush3.bf16.xpose.msra.mxu1 %v479_v41  ;;  %v470_v45 = vadd.f32 %v468_v33, %v415_v42  ;;  %v476_v54 = vadd.f32 %v474_v44, %v455_v51  ;;  %v478_v56 = vpack.c.bf16 %v464_v52, %v464_v52  ;;  %v593_v57 = vsel %vm591_vm1, %v586_v53, 0  ;;  %2822 = vmatprep.subr.bf16.mxu0 %v3477_v1  ;;  %v3095_v41 = vld [vmem:[#allocation7 + $0x8] sm:$0xff]   ;;  %v3096_v42 = vld [vmem:[#allocation7] sm:$0xff]  }
 0x158   :  { %2792 = vmatprep.subr.bf16.mxu1 %v3477_v1  ;;  %v2785_v55 = vpop.f32.mrf.mxu1  ;;  %v3664_v52 = vsub.s32 3, %v3614_v30 }
 0x159   :  { %v480_v49 = vpack.c.bf16 %v470_v45, %v470_v45  ;;  %v587_v27 = vpack.c.bf16 %v476_v54, %v476_v54 }
 0x15a   :  { %2823 = vmatpush3.bf16.msra.mxu0 %v3095_v41  ;;  %v685_v53 = vrot.slane %v3619_v32, %v3664_v52 }
 0x15b   :  { %v639_v34 = vsel %vm591_vm1, %v587_v27, 0  ;;  %2824 = vmatprep.subr.bf16.mxu0 %v3477_v1 }
 0x15e   :  { %2789 = vmatmul.mubr.bf16.vlgmr.msra.gmra.mxu1 %v477_v47  ;;  %2825 = vmatpush3.bf16.msra.mxu0 %v3096_v42 }
 0x15f   :  { %2793 = vmatpush3.bf16.xpose.msra.mxu1 %v480_v49  ;;  %2794 = vmatprep.mubr.msk.bf16.mxu1 %vm3478_vm0, %v3477_v1 }
 0x160   :  { %2798 = vmatprep.subr.bf16.mxu1 %v3477_v1  ;;  %2850 = vmatprep.subr.bf16.mxu0 %v3477_v1 }
 0x166   :  { %2795 = vmatmul.mubr.bf16.vlgmr.msra.gmra.mxu1 %v478_v56 }
 0x167   :  { %2799 = vmatpush3.bf16.msra.mxu1 %v593_v57  ;;  %2800 = vmatprep.mubr.msk.bf16.mxu1 %vm3478_vm0, %v3477_v1 }
 0x168   :  { %2804 = vmatprep.subr.bf16.mxu1 %v3477_v1 }
 0x21e   :  { %v515_v58 = vpop.f32.mrf.mxu1 }
 0x21f   :  { %v562_v59 = vsel %vm561_vm2, %v515_v58, -inf }
 0x220   :  { %563 = vmax.xlane.f32.xlu0 %v562_v59  ;;  %v2790_v60 = vpop.f32.mrf.mxu1 }
 0x222   :  { %v518_v61 = vpop.f32.mrf.mxu1 }
 0x224   :  { %v2791_v62 = vpop.f32.mrf.mxu1 }
 0x225   :  { %v3097_v62 = vld [vmem:[#allocation8 + $0x38] sm:$0xff]  }
 0x226   :  { %v555_v63 = vpop.f32.mrf.mxu1 }
 0x227   :  { %v565_v2 = vsel %vm561_vm2, %v555_v63, -inf }
 0x228   :  { %566 = vmax.xlane.f32.xlu0 %v565_v2  ;;  %v2796_v3 = vpop.f32.mrf.mxu1 }
 0x22a   :  { %v558_v4 = vpop.f32.mrf.mxu1 }
 0x22c   :  { %v2797_v5 = vpop.f32.mrf.mxu1 }
 0x2a9   :  { %v564_v6 = vpop.xlane.xlu0 %563 }
 0x2aa   :  { %v568_v7 = vsub.f32 %v515_v58, %v564_v6 }
 0x2ac   :  { %v570_v8 = vmul.f32 1.442695, %v568_v7 }
 0x2ae   :  { %3209 = vpow2.f32 %v570_v8 }
 0x2b1   :  { %v567_v9 = vpop.xlane.xlu0 %566 }
 0x2b2   :  { %v569_v10 = vsub.f32 %v555_v63, %v567_v9  ;;  %v3672_v63 = vand.u32 127, %v161_v29  ;;  %v3098_v29 = vld [vmem:[#allocation8 + $0x30] sm:$0xff]  }
 0x2b4   :  { %v572_v11 = vmul.f32 1.442695, %v569_v10  ;;  %vm163_vm3 = vcmp.lt.s32.totalorder %v3672_v63, 12  ;;  %v3099_v10 = vld [vmem:[#allocation8 + $0x28] sm:$0xff]  }
 0x2b5   :  { %v3180_v63 = vld [vmem:[#allocation13 + $0x28] sm:$0xff]  }
 0x2b6   :  { %3211 = vpow2.f32 %v572_v11  ;;  %v3100_v11 = vld [vmem:[#allocation8 + $0x20] sm:$0xff]  }
 0x2bb   :  { %v3210_v12 = vpop.eup %3209 }
 0x2bc   :  { %v574_v13 = vsel %vm561_vm2, %v3210_v12, 0.0 }
 0x2bd   :  { %575 = vadd.xlane.f32.xlu1 %v574_v13  ;;  %v3102_v13 = vld [vmem:[#allocation8 + $0x10] sm:$0xff]  }
 0x2c3   :  { %v3212_v14 = vpop.eup %3211 }
 0x2c4   :  { %v577_v15 = vsel %vm561_vm2, %v3212_v14, 0.0 }
 0x2c5   :  { %578 = vadd.xlane.f32.xlu1 %v577_v15  ;;  %v3104_v15 = vld [vmem:[#allocation8] sm:$0xff]  }
 0x346   :  { %v576_v21 = vpop.xlane.xlu1 %575 }
 0x347   :  { %3213 = vrcp.f32 %v576_v21 }
 0x34e   :  { %v579_v22 = vpop.xlane.xlu1 %578 }
 0x34f   :  { %3215 = vrcp.f32 %v579_v22 }
 0x354   :  { %v3214_v25 = vpop.eup %3213 }
 0x355   :  { %v582_v28 = vmul.f32 %v3214_v25, %v3210_v12  ;;  %v3101_v12 = vld [vmem:[#allocation8 + $0x18] sm:$0xff]  }
 0x357   :  { %v584_v33 = vpack.c.bf16 %v582_v28, %v582_v28 }
 0x359   :  { %2801 = vmatmul.mubr.msk.bf16.vlgmr.msra.gmra.mxu1 %vm561_vm2, %v584_v33 }
 0x35a   :  { %2805 = vmatpush3.bf16.msra.mxu1 %v639_v34  ;;  %2806 = vmatprep.mubr.msk.bf16.mxu1 %vm3478_vm0, %v3477_v1  ;;  %v803_v34 = vsub.s32 4, %v3614_v30 }
 0x35b   :  { %2830 = vmatprep.subr.bf16.mxu1 %v3477_v1 }
 0x35c   :  { %v3216_v36 = vpop.eup %3215 }
 0x35d   :  { %v583_v37 = vmul.f32 %v3216_v36, %v3212_v14  ;;  %v3103_v14 = vld [vmem:[#allocation8 + $0x8] sm:$0xff]  }
 0x35f   :  { %v585_v38 = vpack.c.bf16 %v583_v37, %v583_v37 }
 0x361   :  { %2807 = vmatmul.mubr.msk.bf16.vlgmr.msra.gmra.mxu1 %vm561_vm2, %v585_v38  ;;  %v804_v38 = vrot.slane %v3619_v32, %v803_v34 }
 0x362   :  { %2846 = vmatprep.mubr.msk.bf16.mxu1 %vm3478_vm0, %v3477_v1  ;;  %2831 = vmatpush3.bf16.msra.mxu1 %v3097_v62 }
 0x363   :  { %2832 = vmatprep.subr.bf16.mxu1 %v3477_v1 }
 0x366   :  { %2833 = vmatpush3.bf16.msra.mxu1 %v3098_v29 }
 0x367   :  { %2834 = vmatprep.subr.bf16.mxu1 %v3477_v1 }
 0x36a   :  { %2835 = vmatpush3.bf16.msra.mxu1 %v3099_v10  ;;  %v3113_v10 = vld [vmem:[#allocation5 + $0x168] ss:$12 sps:$4 sm:$0xff]  }
 0x36b   :  { %2836 = vmatprep.subr.bf16.mxu1 %v3477_v1 }
 0x36e   :  { %2837 = vmatpush3.bf16.msra.mxu1 %v3100_v11  ;;  %v3115_v11 = vld [vmem:[#allocation5 + $0x16c] ss:$12 sps:$4 sm:$0xff]  }
 0x36f   :  { %2838 = vmatprep.subr.bf16.mxu1 %v3477_v1 }
 0x372   :  { %2839 = vmatpush3.bf16.msra.mxu1 %v3101_v12  ;;  %v3116_v12 = vld [vmem:[#allocation5 + $0x170] ss:$12 sps:$4 sm:$0xff]  }
 0x373   :  { %2840 = vmatprep.subr.bf16.mxu1 %v3477_v1 }
 0x376   :  { %2841 = vmatpush3.bf16.msra.mxu1 %v3102_v13 }
 0x377   :  { %2842 = vmatprep.subr.bf16.mxu1 %v3477_v1 }
 0x37a   :  { %2843 = vmatpush3.bf16.msra.mxu1 %v3103_v14 }
 0x37b   :  { %2844 = vmatprep.subr.bf16.mxu1 %v3477_v1 }
 0x37e   :  { %2845 = vmatpush3.bf16.msra.mxu1 %v3104_v15 }
 0x37f   :  { %1257 = vmatprep.subr.bf16.mxu1 %v3115_v11  ;;  %v3747_v11 = vld [vmem:[#allocation11 + $0x10] sm:$0xff] }
 0x419   :  { %v629_v43 = vpop.f32.mrf.mxu1 }
 0x41b   :  { %v2802_v44 = vpop.f32.mrf.mxu1 }
 0x41c   :  { %v810_v44 = vrot.slane %v3619_v32, %v809_v39 }
 0x41d   :  { %v632_v45 = vpop.f32.mrf.mxu1 }
 0x41f   :  { %v2803_v46 = vpop.f32.mrf.mxu1 }
 0x421   :  { %v675_v47 = vpop.f32.mrf.mxu1 }
 0x422   :  { %v681_v48 = vpack.c.bf16 %v675_v47, %v629_v43 }
 0x423   :  { %v2808_v49 = vpop.f32.mrf.mxu1 }
 0x424   :  { %2827 = vmatmul.mubr.bf16.vlgmr.msra.gmra.mxu0 %v681_v48  ;;  %v3110_v49 = vld [vmem:[#allocation10 + $0x10] sm:$0xff]  }
 0x425   :  { %v678_v50 = vpop.f32.mrf.mxu1  ;;  %2866 = vmatprep.mubr.msk.bf16.mxu0 %vm3478_vm0, %v3477_v1  ;;  %2851 = vmatpush3.bf16.msra.mxu0 %v3105_v16 }
 0x426   :  { %2852 = vmatprep.subr.bf16.mxu0 %v3477_v1  ;;  %v3111_v50 = vld [vmem:[#allocation10 + $0x8] sm:$0xff]  }
 0x427   :  { %v2809_v51 = vpop.f32.mrf.mxu1 }
 0x428   :  { %v3112_v51 = vld [vmem:[#allocation10] sm:$0xff]  }
 0x429   :  { %2853 = vmatpush3.bf16.msra.mxu0 %v3106_v17 }
 0x42a   :  { %2854 = vmatprep.subr.bf16.mxu0 %v3477_v1 }
 0x42d   :  { %2855 = vmatpush3.bf16.msra.mxu0 %v3107_v18 }
 0x42e   :  { %2856 = vmatprep.subr.bf16.mxu0 %v3477_v1 }
 0x431   :  { %2857 = vmatpush3.bf16.msra.mxu0 %v3108_v19 }
 0x432   :  { %2858 = vmatprep.subr.bf16.mxu0 %v3477_v1 }
 0x435   :  { %2859 = vmatpush3.bf16.msra.mxu0 %v3109_v20 }
 0x436   :  { %2860 = vmatprep.subr.bf16.mxu0 %v3477_v1 }
 0x439   :  { %2861 = vmatpush3.bf16.msra.mxu0 %v3110_v49  ;;  %v3137_v49 = vld [vmem:[#allocation5 + $0xd8] ss:$12 sps:$4 sm:$0xff]  }
 0x43a   :  { %2862 = vmatprep.subr.bf16.mxu0 %v3477_v1 }
 0x43d   :  { %2863 = vmatpush3.bf16.msra.mxu0 %v3111_v50  ;;  %v3140_v50 = vld [vmem:[#allocation5 + $0xe0] ss:$12 sps:$4 sm:$0xff]  }
 0x43e   :  { %2864 = vmatprep.subr.bf16.mxu0 %v3477_v1 }
 0x441   :  { %2865 = vmatpush3.bf16.msra.mxu0 %v3112_v51  ;;  %v3143_v51 = vld [vmem:[#allocation5 + $0xc4] ss:$12 sps:$4 sm:$0xff]  }
 0x442   :  { %2870 = vmatprep.subr.bf16.mxu0 %v3477_v1 }
 0x4e4   :  { %v768_v54 = vpop.f32.mrf.mxu0 }
 0x4e5   :  { %v769_v55 = vadd.f32 %v768_v54, %v685_v53 }
 0x4e6   :  { %v2828_v56 = vpop.f32.mrf.mxu0 }
 0x4e7   :  { %v775_v57 = vadd.f32 %v769_v55, %v3593_v23 }
 0x4e8   :  { %v771_v58 = vpop.f32.mrf.mxu0 }
 0x4e9   :  { %v772_v59 = vadd.f32 %v771_v58, %v685_v53  ;;  %777 = vadd.xlane.f32.xlu0 %v775_v57  ;;  %v816_v53 = vsub.s32 6, %v3614_v30 }
 0x4ea   :  { %v2829_v60 = vpop.f32.mrf.mxu0 }
 0x4eb   :  { %v776_v61 = vadd.f32 %v772_v59, %v3595_v24  ;;  %v817_v54 = vrot.slane %v3619_v32, %v816_v53 }
 0x4ed   :  { %779 = vadd.xlane.f32.xlu1 %v776_v61 }
 0x572   :  { %v778_v2 = vpop.xlane.xlu0 %777 }
 0x573   :  { %v781_v3 = vmul.f32 0.083333336, %v778_v2 }
 0x575   :  { %v783_v4 = vsub.f32 %v775_v57, %v781_v3  ;;  %v912_v3 = vsub.s32 7, %v3614_v30 }
 0x576   :  { %v780_v23 = vpop.xlane.xlu1 %779 }
 0x577   :  { %v782_v5 = vmul.f32 0.083333336, %v780_v23  ;;  %v785_v6 = vsel %vm163_vm3, %v783_v4, 0.0  ;;  %v913_v4 = vrot.slane %v3619_v32, %v912_v3 }
 0x578   :  { %v787_v7 = vmul.f32 %v785_v6, %v785_v6 }
 0x579   :  { %v784_v24 = vsub.f32 %v776_v61, %v782_v5 }
 0x57a   :  { %789 = vadd.xlane.f32.xlu0 %v787_v7 }
 0x57b   :  { %v786_v8 = vsel %vm163_vm3, %v784_v24, 0.0 }
 0x57c   :  { %v788_v9 = vmul.f32 %v786_v8, %v786_v8 }
 0x57e   :  { %791 = vadd.xlane.f32.xlu1 %v788_v9 }
 0x603   :  { %v790_v21 = vpop.xlane.xlu0 %789 }
 0x604   :  { %v793_v22 = vmul.f32 0.083333336, %v790_v21 }
 0x606   :  { %v795_v25 = vadd.f32 1e-05, %v793_v22  ;;  %v3119_v22 = vld [vmem:[#allocation5 + $0x154] ss:$12 sps:$4 sm:$0xff]  }
 0x607   :  { %v792_v27 = vpop.xlane.xlu1 %791 }
 0x608   :  { %3217 = vrsqrt.f32 %v795_v25  ;;  %v794_v28 = vmul.f32 0.083333336, %v792_v27  ;;  %v3117_v25 = vld [vmem:[#allocation5 + $0x150] ss:$12 sps:$4 sm:$0xff]   ;;  %v3120_v27 = vld [vmem:[#allocation5 + $0x158] ss:$12 sps:$4 sm:$0xff]  }
 0x60a   :  { %v796_v33 = vadd.f32 1e-05, %v794_v28  ;;  %v3123_v28 = vld [vmem:[#allocation5 + $0x13c] ss:$12 sps:$4 sm:$0xff]  }
 0x60c   :  { %3219 = vrsqrt.f32 %v796_v33  ;;  %v3121_v33 = vld [vmem:[#allocation5 + $0x138] ss:$12 sps:$4 sm:$0xff]  }
 0x615   :  { %v3218_v36 = vpop.eup %3217 }
 0x616   :  { %v799_v37 = vmul.f32 %v3218_v36, %v785_v6  ;;  %v3124_v36 = vld [vmem:[#allocation5 + $0x140] ss:$12 sps:$4 sm:$0xff]  }
 0x618   :  { %v805_v43 = vmul.f32 %v804_v38, %v799_v37  ;;  %v3125_v37 = vld [vmem:[#allocation5 + $0x120] ss:$12 sps:$4 sm:$0xff]  }
 0x619   :  { %v3220_v41 = vpop.eup %3219 }
 0x61a   :  { %v800_v42 = vmul.f32 %v3220_v41, %v786_v8  ;;  %v811_v46 = vadd.f32 %v810_v44, %v805_v43  ;;  %v3128_v41 = vld [vmem:[#allocation5 + $0x128] ss:$12 sps:$4 sm:$0xff]  }
 0x61b   :  { %v3129_v43 = vld [vmem:[#allocation5 + $0x108] ss:$12 sps:$4 sm:$0xff]  }
 0x61c   :  { %v806_v45 = vmul.f32 %v804_v38, %v800_v42  ;;  %v3127_v38 = vld [vmem:[#allocation5 + $0x124] ss:$12 sps:$4 sm:$0xff]   ;;  %v3131_v42 = vld [vmem:[#allocation5 + $0x10c] ss:$12 sps:$4 sm:$0xff]  }
 0x61e   :  { %v812_v47 = vadd.f32 %v810_v44, %v806_v45  ;;  %v3132_v44 = vld [vmem:[#allocation5 + $0x110] ss:$12 sps:$4 sm:$0xff]   ;;  %v3135_v45 = vld [vmem:[#allocation5 + $0xf4] ss:$12 sps:$4 sm:$0xff]  }
 0x620   :  { %v813_v48 = vpack.c.bf16 %v812_v47, %v811_v46 }
 0x622   :  { %2847 = vmatmul.mubr.bf16.vlgmr.msra.gmra.mxu1 %v813_v48  ;;  %v3139_v48 = vld [vmem:[#allocation5 + $0xdc] ss:$12 sps:$4 sm:$0xff]  }
 0x623   :  { %1289 = vmatprep.mubr.bf16.mxu1 %v3476_v0  ;;  %1258 = vmatpush1.bf16.msra.mxu1 %v3113_v10 }
 0x624   :  { %1259 = vmatprep.subr.bf16.mxu1 %v3119_v22 }
 0x627   :  { %1260 = vmatpush1.bf16.msra.mxu1 %v3117_v25 }
 0x628   :  { %1261 = vmatprep.subr.bf16.mxu1 %v3123_v28 }
 0x62b   :  { %1262 = vmatpush1.bf16.msra.mxu1 %v3121_v33 }
 0x62c   :  { %1263 = vmatprep.subr.bf16.mxu1 %v3127_v38 }
 0x62f   :  { %1264 = vmatpush1.bf16.msra.mxu1 %v3125_v37 }
 0x630   :  { %1265 = vmatprep.subr.bf16.mxu1 %v3131_v42 }
 0x633   :  { %1266 = vmatpush1.bf16.msra.mxu1 %v3129_v43 }
 0x634   :  { %1267 = vmatprep.subr.bf16.mxu1 %v3135_v45 }
 0x6e2   :  { %v900_v55 = vpop.f32.mrf.mxu1 }
 0x6e3   :  { %v901_v57 = vadd.f32 %v900_v55, %v817_v54  ;;  %v3144_v55 = vld [vmem:[#allocation5 + $0xc8] ss:$12 sps:$4 sm:$0xff]  }
 0x6e4   :  { %v2848_v56 = vpop.f32.mrf.mxu1 }
 0x6e5   :  { %v907_v61 = vmax.f32 %v901_v57, 0.0 }
 0x6e6   :  { %v903_v58 = vpop.f32.mrf.mxu1 }
 0x6e7   :  { %v904_v59 = vadd.f32 %v903_v58, %v817_v54  ;;  %v3141_v54 = vld [vmem:[#allocation5 + $0xc0] ss:$12 sps:$4 sm:$0xff]  }
 0x6e8   :  { %v2849_v60 = vpop.f32.mrf.mxu1 }
 0x6e9   :  { %v908_v62 = vmax.f32 %v904_v59, 0.0 }
 0x6eb   :  { %v909_v2 = vpack.c.bf16 %v908_v62, %v907_v61  ;;  %v245_v62 = vld [vmem:[#allocation11 + $0x8] sm:$0xff] }
 0x6ed   :  { %2867 = vmatmul.mubr.bf16.vlgmr.msra.gmra.mxu0 %v909_v2 }
 0x6ee   :  { %2886 = vmatprep.mubr.msk.bf16.mxu0 %vm3478_vm0, %v3477_v1  ;;  %2871 = vmatpush3.bf16.msra.mxu0 %v3116_v12  ;;  %v1350_v12 = vrot.slane %v3747_v11, %v3617_v31 }
 0x6ef   :  { %2872 = vmatprep.subr.bf16.mxu0 %v3477_v1 }
 0x6f2   :  { %2873 = vmatpush3.bf16.msra.mxu0 %v3120_v27 }
 0x6f3   :  { %2874 = vmatprep.subr.bf16.mxu0 %v3477_v1 }
 0x6f6   :  { %2875 = vmatpush3.bf16.msra.mxu0 %v3124_v36 }
 0x6f7   :  { %2876 = vmatprep.subr.bf16.mxu0 %v3477_v1 }
 0x6fa   :  { %2877 = vmatpush3.bf16.msra.mxu0 %v3128_v41 }
 0x6fb   :  { %2878 = vmatprep.subr.bf16.mxu0 %v3477_v1 }
 0x6fe   :  { %2879 = vmatpush3.bf16.msra.mxu0 %v3132_v44 }
 0x6ff   :  { %2880 = vmatprep.subr.bf16.mxu0 %v3477_v1 }
 0x7ad   :  { %v996_v23 = vpop.f32.mrf.mxu0 }
 0x7ae   :  { %v997_v5 = vadd.f32 %v996_v23, %v913_v4  ;;  %v1032_v23 = vrot.slane %v245_v62, %v3624_v35 }
 0x7af   :  { %v2868_v6 = vpop.f32.mrf.mxu0 }
 0x7b0   :  { %v1003_v7 = vadd.f32 %v997_v5, %v811_v46  ;;  %v3133_v46 = vld [vmem:[#allocation5 + $0xf0] ss:$12 sps:$4 sm:$0xff]  }
 0x7b1   :  { %v999_v24 = vpop.f32.mrf.mxu0  ;;  %1268 = vmatpush1.bf16.msra.mxu1 %v3133_v46 }
 0x7b2   :  { %v1000_v8 = vadd.f32 %v999_v24, %v913_v4  ;;  %1005 = vadd.xlane.f32.xlu0 %v1003_v7  ;;  %1269 = vmatprep.subr.bf16.mxu1 %v3139_v48  ;;  %v1038_v24 = vrot.slane %v245_v62, %v3617_v31 }
 0x7b3   :  { %v2869_v9 = vpop.f32.mrf.mxu0 }
 0x7b4   :  { %v1004_v29 = vadd.f32 %v1000_v8, %v812_v47  ;;  %v3136_v47 = vld [vmem:[#allocation5 + $0xf8] ss:$12 sps:$4 sm:$0xff]  }
 0x7b5   :  { %2881 = vmatpush3.bf16.msra.mxu0 %v3136_v47  ;;  %1270 = vmatpush1.bf16.msra.mxu1 %v3137_v49 }
 0x7b6   :  { %1007 = vadd.xlane.f32.xlu1 %v1004_v29  ;;  %2882 = vmatprep.subr.bf16.mxu0 %v3477_v1 }
 0x7b7   :  { %1271 = vmatprep.subr.bf16.mxu1 %v3143_v51 }
 0x7b9   :  { %2883 = vmatpush3.bf16.msra.mxu0 %v3140_v50  ;;  %1272 = vmatpush1.bf16.msra.mxu1 %v3141_v54 }
 0x7ba   :  { %2884 = vmatprep.subr.bf16.mxu0 %v3477_v1  ;;  %2890 = vmatprep.subr.bf16.mxu1 %v3477_v1 }
 0x7bd   :  { %2885 = vmatpush3.bf16.msra.mxu0 %v3144_v55 }
 0x7be   :  { %2914 = vmatprep.subr.bf16.mxu0 %v3477_v1 }
 0x83b   :  { %v1006_v13 = vpop.xlane.xlu0 %1005 }
 0x83c   :  { %v1009_v32 = vmul.f32 0.083333336, %v1006_v13 }
 0x83e   :  { %v1011_v14 = vsub.f32 %v1003_v7, %v1009_v32 }
 0x83f   :  { %v1008_v15 = vpop.xlane.xlu1 %1007 }
 0x840   :  { %v1010_v16 = vmul.f32 0.083333336, %v1008_v15  ;;  %v3715_v17 = vsel %vm163_vm3, %v1011_v14, 0.0 }
 0x841   :  { %v1015_v18 = vmul.f32 %v3715_v17, %v3715_v17 }
 0x842   :  { %v1012_v19 = vsub.f32 %v1004_v29, %v1010_v16  ;;  %v1356_v16 = vrot.slane %v3747_v11, %v3629_v40 }
 0x843   :  { %1017 = vadd.xlane.f32.xlu0 %v1015_v18  ;;  %v1344_v18 = vrot.slane %v3747_v11, %v3624_v35 }
 0x844   :  { %v3721_v20 = vsel %vm163_vm3, %v1012_v19, 0.0 }
 0x845   :  { %v1016_v21 = vmul.f32 %v3721_v20, %v3721_v20 }
 0x847   :  { %1019 = vadd.xlane.f32.xlu1 %v1016_v21 }
 0x8cc   :  { %v1018_v56 = vpop.xlane.xlu0 %1017 }
 0x8cd   :  { %v1021_v57 = vmul.f32 0.083333336, %v1018_v56 }
 0x8cf   :  { %v1023_v58 = vadd.f32 1e-05, %v1021_v57 }
 0x8d0   :  { %v1020_v59 = vpop.xlane.xlu1 %1019 }
 0x8d1   :  { %3221 = vrsqrt.f32 %v1023_v58  ;;  %v1022_v60 = vmul.f32 0.083333336, %v1020_v59 }
 0x8d3   :  { %v1024_v61 = vadd.f32 1e-05, %v1022_v60 }
 0x8d5   :  { %3223 = vrsqrt.f32 %v1024_v61 }
 0x8de   :  { %v3222_v2 = vpop.eup %3221 }
 0x8df   :  { %v1027_v4 = vmul.f32 %v3222_v2, %v3715_v17 }
 0x8e1   :  { %v1033_v7 = vmul.f32 %v1032_v23, %v1027_v4 }
 0x8e2   :  { %v3224_v5 = vpop.eup %3223 }
 0x8e3   :  { %v1028_v6 = vmul.f32 %v3224_v5, %v3721_v20  ;;  %v3737_v9 = vadd.f32 %v1038_v24, %v1033_v7  ;;  %v3146_v7 = vld [vmem:[#allocation7 + $0x70] sm:$0xff]  }
 0x8e5   :  { %v1034_v8 = vmul.f32 %v1032_v23, %v1028_v6  ;;  %v3145_v6 = vld [vmem:[#allocation7 + $0x78] sm:$0xff]  }
 0x8e7   :  { %v3739_v29 = vadd.f32 %v1038_v24, %v1034_v8  ;;  %v3147_v24 = vld [vmem:[#allocation7 + $0x68] sm:$0xff]   ;;  %v3148_v8 = vld [vmem:[#allocation7 + $0x60] sm:$0xff]  }
 0x8e9   :  { %v1128_v10 = vpack.c.bf16 %v3739_v29, %v3737_v9 }
 0x8eb   :  { %1290 = vmatmul.mubr.bf16.vlgmr.msra.gmra.mxu1 %v1128_v10  ;;  %2887 = vmatmul.mubr.bf16.vlgmr.msra.gmra.mxu0 %v1128_v10  ;;  %v3149_v10 = vld [vmem:[#allocation7 + $0x58] sm:$0xff]  }
 0x8ec   :  { %2892 = vmatprep.mubr.msk.bf16.mxu1 %vm3478_vm0, %v3477_v1  ;;  %2930 = vmatprep.mubr.msk.bf16.mxu0 %vm3478_vm0, %v3477_v1 }
 0x8ed   :  { %2915 = vmatpush3.bf16.msra.mxu0 %v3145_v6  ;;  %v3157_v6 = vld [vmem:[#allocation8 + $0x58] sm:$0xff]  }
 0x8ee   :  { %2916 = vmatprep.subr.bf16.mxu0 %v3477_v1 }
 0x8f1   :  { %2917 = vmatpush3.bf16.msra.mxu0 %v3146_v7  ;;  %v3158_v7 = vld [vmem:[#allocation8 + $0x50] sm:$0xff]  }
 0x8f2   :  { %2918 = vmatprep.subr.bf16.mxu0 %v3477_v1 }
 0x8f5   :  { %2919 = vmatpush3.bf16.msra.mxu0 %v3147_v24  ;;  %v3159_v24 = vld [vmem:[#allocation8 + $0x48] sm:$0xff]  }
 0x8f6   :  { %2920 = vmatprep.subr.bf16.mxu0 %v3477_v1 }
 0x8f9   :  { %2921 = vmatpush3.bf16.msra.mxu0 %v3148_v8  ;;  %v3160_v8 = vld [vmem:[#allocation8 + $0x40] sm:$0xff]  }
 0x8fa   :  { %2922 = vmatprep.subr.bf16.mxu0 %v3477_v1 }
 0x8fd   :  { %2923 = vmatpush3.bf16.msra.mxu0 %v3149_v10  ;;  %v3161_v10 = vld [vmem:[#allocation10 + $0x78] sm:$0xff]  }
 0x8fe   :  { %2924 = vmatprep.subr.bf16.mxu0 %v3477_v1 }
 0x9ab   :  { %v1291_v13 = vpop.f32.mrf.mxu1  ;;  %v1334_v32 = vpop.f32.mrf.mxu0 }
 0x9ac   :  { %v1345_v28 = vadd.f32 %v1344_v18, %v1291_v13  ;;  %v1357_v38 = vadd.f32 %v1356_v16, %v1334_v32 }
 0x9ad   :  { %v1293_v14 = vpop.f32.mrf.mxu1  ;;  %v2888_v15 = vpop.f32.mrf.mxu0 }
 0x9ae   :  { %v1351_v17 = vadd.f32 %v1350_v12, %v1293_v14  ;;  %v1359_v36 = vpack.c.bf16 %v1345_v28, %v1345_v28  ;;  %v1467_v42 = vpack.c.bf16 %v1357_v38, %v1357_v38 }
 0x9af   :  { %v1295_v19 = vpop.f32.mrf.mxu1  ;;  %v1337_v20 = vpop.f32.mrf.mxu0 }
 0x9b0   :  { %v1361_v21 = vpack.c.bf16 %v1351_v17, %v1351_v17  ;;  %v3755_v22 = vadd.f32 %v1356_v16, %v1337_v20  ;;  %v1346_v41 = vadd.f32 %v1344_v18, %v1295_v19  ;;  %v1473_v44 = vsel %vm591_vm1, %v1467_v42, 0 }
 0x9b1   :  { %v1297_v25 = vpop.f32.mrf.mxu1  ;;  %v2889_v27 = vpop.f32.mrf.mxu0 }
 0x9b2   :  { %2891 = vmatpush3.bf16.xpose.msra.mxu1 %v1361_v21  ;;  %v1352_v33 = vadd.f32 %v1350_v12, %v1297_v25  ;;  %v1360_v43 = vpack.c.bf16 %v1346_v41, %v1346_v41  ;;  %v1468_v14 = vpack.c.bf16 %v3755_v22, %v3755_v22  ;;  %v3150_v21 = vld [vmem:[#allocation7 + $0x50] sm:$0xff]   ;;  %v3151_v22 = vld [vmem:[#allocation7 + $0x48] sm:$0xff]   ;;  %v3152_v25 = vld [vmem:[#allocation7 + $0x40] sm:$0xff]  }
 0x9b3   :  { %2896 = vmatprep.subr.bf16.mxu1 %v3477_v1  ;;  %2925 = vmatpush3.bf16.msra.mxu0 %v3150_v21 }
 0x9b4   :  { %v1362_v37 = vpack.c.bf16 %v1352_v33, %v1352_v33  ;;  %v1519_v17 = vsel %vm591_vm1, %v1468_v14, 0  ;;  %2926 = vmatprep.subr.bf16.mxu0 %v3477_v1  ;;  %v3165_v14 = vld [vmem:[#allocation10 + $0x58] sm:$0xff]  }
 0x9b7   :  { %2927 = vmatpush3.bf16.msra.mxu0 %v3151_v22 }
 0x9b8   :  { %2928 = vmatprep.subr.bf16.mxu0 %v3477_v1 }
 0x9b9   :  { %2893 = vmatmul.mubr.bf16.vlgmr.msra.gmra.mxu1 %v1359_v36 }
 0x9ba   :  { %2897 = vmatpush3.bf16.xpose.msra.mxu1 %v1362_v37  ;;  %2898 = vmatprep.mubr.msk.bf16.mxu1 %vm3478_vm0, %v3477_v1 }
 0x9bb   :  { %2902 = vmatprep.subr.bf16.mxu1 %v3477_v1  ;;  %2929 = vmatpush3.bf16.msra.mxu0 %v3152_v25  ;;  %v1684_v25 = vrot.slane %v3747_v11, %v803_v34  ;;  %v3167_v34 = vld [vmem:[#allocation10 + $0x48] sm:$0xff]  }
 0x9bc   :  { %2954 = vmatprep.subr.bf16.mxu0 %v3477_v1 }
 0x9c1   :  { %2899 = vmatmul.mubr.bf16.vlgmr.msra.gmra.mxu1 %v1360_v43 }
 0x9c2   :  { %2903 = vmatpush3.bf16.msra.mxu1 %v1473_v44  ;;  %2904 = vmatprep.mubr.msk.bf16.mxu1 %vm3478_vm0, %v3477_v1  ;;  %v1565_v44 = vrot.slane %v3747_v11, %v3664_v52 }
 0x9c3   :  { %2908 = vmatprep.subr.bf16.mxu1 %v3477_v1 }
 0xa79   :  { %v1397_v45 = vpop.f32.mrf.mxu1 }
 0xa7a   :  { %v1443_v46 = vsel %vm561_vm2, %v1397_v45, -inf }
 0xa7b   :  { %1444 = vmax.xlane.f32.xlu0 %v1443_v46  ;;  %v2894_v47 = vpop.f32.mrf.mxu1 }
 0xa7d   :  { %v1400_v48 = vpop.f32.mrf.mxu1 }
 0xa7f   :  { %v2895_v49 = vpop.f32.mrf.mxu1 }
 0xa81   :  { %v1437_v50 = vpop.f32.mrf.mxu1 }
 0xa82   :  { %v1446_v51 = vsel %vm561_vm2, %v1437_v50, -inf }
 0xa83   :  { %1447 = vmax.xlane.f32.xlu1 %v1446_v51  ;;  %v2900_v54 = vpop.f32.mrf.mxu1 }
 0xa85   :  { %v1440_v55 = vpop.f32.mrf.mxu1 }
 0xa86   :  { %v3153_v55 = vld [vmem:[#allocation8 + $0x78] sm:$0xff]  }
 0xa87   :  { %v2901_v56 = vpop.f32.mrf.mxu1 }
 0xb04   :  { %v1445_v57 = vpop.xlane.xlu0 %1444 }
 0xb05   :  { %v1449_v58 = vsub.f32 %v1397_v45, %v1445_v57 }
 0xb07   :  { %v1451_v59 = vmul.f32 1.442695, %v1449_v58 }
 0xb09   :  { %3225 = vpow2.f32 %v1451_v59 }
 0xb0c   :  { %v1448_v60 = vpop.xlane.xlu1 %1447 }
 0xb0d   :  { %v1450_v61 = vsub.f32 %v1437_v50, %v1448_v60 }
 0xb0f   :  { %v1453_v62 = vmul.f32 1.442695, %v1450_v61 }
 0xb11   :  { %3227 = vpow2.f32 %v1453_v62 }
 0xb16   :  { %v3226_v2 = vpop.eup %3225 }
 0xb17   :  { %v1455_v4 = vsel %vm561_vm2, %v3226_v2, 0.0 }
 0xb18   :  { %1456 = vadd.xlane.f32.xlu0 %v1455_v4  ;;  %v3154_v4 = vld [vmem:[#allocation8 + $0x70] sm:$0xff]  }
 0xb1e   :  { %v3228_v23 = vpop.eup %3227 }
 0xb1f   :  { %v1458_v5 = vsel %vm561_vm2, %v3228_v23, 0.0 }
 0xb20   :  { %1459 = vadd.xlane.f32.xlu1 %v1458_v5  ;;  %v3156_v5 = vld [vmem:[#allocation8 + $0x60] sm:$0xff]  }
 0xba1   :  { %v1457_v12 = vpop.xlane.xlu0 %1456 }
 0xba2   :  { %3229 = vrcp.f32 %v1457_v12  ;;  %v3162_v12 = vld [vmem:[#allocation10 + $0x70] sm:$0xff]  }
 0xba9   :  { %v1460_v13 = vpop.xlane.xlu1 %1459 }
 0xbaa   :  { %3231 = vrcp.f32 %v1460_v13  ;;  %v3163_v13 = vld [vmem:[#allocation10 + $0x68] sm:$0xff]  }
 0xbaf   :  { %v3230_v32 = vpop.eup %3229 }
 0xbb0   :  { %v1463_v15 = vmul.f32 %v3230_v32, %v3226_v2  ;;  %v3164_v32 = vld [vmem:[#allocation10 + $0x60] sm:$0xff]  }
 0xbb2   :  { %v1465_v16 = vpack.c.bf16 %v1463_v15, %v1463_v15 }
 0xbb4   :  { %2905 = vmatmul.mubr.msk.bf16.vlgmr.msra.gmra.mxu1 %vm561_vm2, %v1465_v16 }
 0xbb5   :  { %2909 = vmatpush3.bf16.msra.mxu1 %v1519_v17  ;;  %2910 = vmatprep.mubr.msk.bf16.mxu1 %vm3478_vm0, %v3477_v1 }
 0xbb6   :  { %2934 = vmatprep.subr.bf16.mxu1 %v3477_v1 }
 0xbb7   :  { %v3232_v18 = vpop.eup %3231 }
 0xbb8   :  { %v1464_v19 = vmul.f32 %v3232_v18, %v3228_v23  ;;  %v3155_v23 = vld [vmem:[#allocation8 + $0x68] sm:$0xff]  }
 0xbba   :  { %v1466_v20 = vpack.c.bf16 %v1464_v19, %v1464_v19 }
 0xbbc   :  { %2911 = vmatmul.mubr.msk.bf16.vlgmr.msra.gmra.mxu1 %vm561_vm2, %v1466_v20 }
 0xbbd   :  { %2950 = vmatprep.mubr.msk.bf16.mxu1 %vm3478_vm0, %v3477_v1  ;;  %2935 = vmatpush3.bf16.msra.mxu1 %v3153_v55 }
 0xbbe   :  { %2936 = vmatprep.subr.bf16.mxu1 %v3477_v1 }
 0xbc1   :  { %2937 = vmatpush3.bf16.msra.mxu1 %v3154_v4 }
 0xbc2   :  { %2938 = vmatprep.subr.bf16.mxu1 %v3477_v1 }
 0xbc5   :  { %2939 = vmatpush3.bf16.msra.mxu1 %v3155_v23 }
 0xbc6   :  { %2940 = vmatprep.subr.bf16.mxu1 %v3477_v1 }
 0xbc9   :  { %2941 = vmatpush3.bf16.msra.mxu1 %v3156_v5 }
 0xbca   :  { %2942 = vmatprep.subr.bf16.mxu1 %v3477_v1 }
 0xbcd   :  { %2943 = vmatpush3.bf16.msra.mxu1 %v3157_v6 }
 0xbce   :  { %2944 = vmatprep.subr.bf16.mxu1 %v3477_v1 }
 0xbd1   :  { %2945 = vmatpush3.bf16.msra.mxu1 %v3158_v7 }
 0xbd2   :  { %2946 = vmatprep.subr.bf16.mxu1 %v3477_v1 }
 0xbd5   :  { %2947 = vmatpush3.bf16.msra.mxu1 %v3159_v24 }
 0xbd6   :  { %2948 = vmatprep.subr.bf16.mxu1 %v3477_v1 }
 0xbd9   :  { %2949 = vmatpush3.bf16.msra.mxu1 %v3160_v8  ;;  %v3172_v8 = vld [vmem:[#allocation13 + $0x38] sm:$0xff]  }
 0xbda   :  { %2974 = vmatprep.subr.bf16.mxu1 %v3477_v1 }
 0xc74   :  { %v1509_v27 = vpop.f32.mrf.mxu1 }
 0xc76   :  { %v2906_v28 = vpop.f32.mrf.mxu1 }
 0xc78   :  { %v1512_v33 = vpop.f32.mrf.mxu1 }
 0xc7a   :  { %v2907_v36 = vpop.f32.mrf.mxu1 }
 0xc7b   :  { %v1690_v36 = vrot.slane %v3747_v11, %v809_v39  ;;  %v1697_v39 = vrot.slane %v3747_v11, %v816_v53 }
 0xc7c   :  { %v1555_v37 = vpop.f32.mrf.mxu1 }
 0xc7d   :  { %v1561_v38 = vpack.c.bf16 %v1555_v37, %v1509_v27 }
 0xc7e   :  { %v2912_v41 = vpop.f32.mrf.mxu1 }
 0xc7f   :  { %2931 = vmatmul.mubr.bf16.vlgmr.msra.gmra.mxu0 %v1561_v38 }
 0xc80   :  { %v1558_v42 = vpop.f32.mrf.mxu1  ;;  %2970 = vmatprep.mubr.msk.bf16.mxu0 %vm3478_vm0, %v3477_v1  ;;  %2955 = vmatpush3.bf16.msra.mxu0 %v3161_v10  ;;  %v3175_v10 = vld [vmem:[#allocation14 + $0x64] ss:$8 sps:$4 sm:$0xff]  }
 0xc81   :  { %2956 = vmatprep.subr.bf16.mxu0 %v3477_v1 }
 0xc82   :  { %v2913_v43 = vpop.f32.mrf.mxu1 }
 0xc83   :  { %v3166_v43 = vld [vmem:[#allocation10 + $0x50] sm:$0xff]  }
 0xc84   :  { %2957 = vmatpush3.bf16.msra.mxu0 %v3162_v12  ;;  %v3173_v12 = vld [vmem:[#allocation14 + $0x60] ss:$8 sps:$4 sm:$0xff]  }
 0xc85   :  { %2958 = vmatprep.subr.bf16.mxu0 %v3477_v1 }
 0xc88   :  { %2959 = vmatpush3.bf16.msra.mxu0 %v3163_v13  ;;  %v3176_v13 = vld [vmem:[#allocation13 + $0x30] sm:$0xff]  }
 0xc89   :  { %2960 = vmatprep.subr.bf16.mxu0 %v3477_v1 }
 0xc8c   :  { %2961 = vmatpush3.bf16.msra.mxu0 %v3164_v32  ;;  %v3179_v32 = vld [vmem:[#allocation14 + $0x54] ss:$8 sps:$4 sm:$0xff]  }
 0xc8d   :  { %2962 = vmatprep.subr.bf16.mxu0 %v3477_v1 }
 0xc90   :  { %2963 = vmatpush3.bf16.msra.mxu0 %v3165_v14  ;;  %v3177_v14 = vld [vmem:[#allocation14 + $0x50] ss:$8 sps:$4 sm:$0xff]  }
 0xc91   :  { %2964 = vmatprep.subr.bf16.mxu0 %v3477_v1 }
 0xc94   :  { %2965 = vmatpush3.bf16.msra.mxu0 %v3166_v43 }
 0xc95   :  { %2966 = vmatprep.subr.bf16.mxu0 %v3477_v1 }
 0xc98   :  { %2967 = vmatpush3.bf16.msra.mxu0 %v3167_v34 }
 0xc99   :  { %2968 = vmatprep.subr.bf16.mxu0 %v3477_v1 }
 0xd3f   :  { %v1648_v45 = vpop.f32.mrf.mxu0 }
 0xd40   :  { %v1649_v46 = vadd.f32 %v1648_v45, %v1565_v44 }
 0xd41   :  { %v2932_v47 = vpop.f32.mrf.mxu0 }
 0xd42   :  { %v1655_v48 = vadd.f32 %v1649_v46, %v3737_v9 }
 0xd43   :  { %v1651_v49 = vpop.f32.mrf.mxu0 }
 0xd44   :  { %v1652_v50 = vadd.f32 %v1651_v49, %v1565_v44  ;;  %1657 = vadd.xlane.f32.xlu0 %v1655_v48  ;;  %v3168_v44 = vld [vmem:[#allocation10 + $0x40] sm:$0xff]  }
 0xd45   :  { %v2933_v51 = vpop.f32.mrf.mxu0  ;;  %2969 = vmatpush3.bf16.msra.mxu0 %v3168_v44 }
 0xd46   :  { %v1656_v54 = vadd.f32 %v1652_v50, %v3739_v29 }
 0xd48   :  { %1659 = vadd.xlane.f32.xlu1 %v1656_v54 }
 0xdcd   :  { %v1658_v56 = vpop.xlane.xlu0 %1657 }
 0xdce   :  { %v1661_v57 = vmul.f32 0.083333336, %v1658_v56  ;;  %v1793_v56 = vrot.slane %v3747_v11, %v912_v3 }
 0xdd0   :  { %v1663_v58 = vsub.f32 %v1655_v48, %v1661_v57 }
 0xdd1   :  { %v1660_v59 = vpop.xlane.xlu1 %1659 }
 0xdd2   :  { %v1662_v60 = vmul.f32 0.083333336, %v1660_v59  ;;  %v1665_v61 = vsel %vm163_vm3, %v1663_v58, 0.0 }
 0xdd3   :  { %v1667_v9 = vmul.f32 %v1665_v61, %v1665_v61 }
 0xdd4   :  { %v1664_v62 = vsub.f32 %v1656_v54, %v1662_v60 }
 0xdd5   :  { %1669 = vadd.xlane.f32.xlu0 %v1667_v9 }
 0xdd6   :  { %v1666_v2 = vsel %vm163_vm3, %v1664_v62, 0.0 }
 0xdd7   :  { %v1668_v29 = vmul.f32 %v1666_v2, %v1666_v2 }
 0xdd9   :  { %1671 = vadd.xlane.f32.xlu1 %v1668_v29  ;;  %v3171_v29 = vld [vmem:[#allocation14 + $0x74] ss:$8 sps:$4 sm:$0xff]  }
 0xdda   :  { %2128 = vmatprep.subr.bf16.mxu0 %v3171_v29 }
 0xe5e   :  { %v1670_v15 = vpop.xlane.xlu0 %1669 }
 0xe5f   :  { %v1673_v16 = vmul.f32 0.083333336, %v1670_v15  ;;  %v3181_v15 = vld [vmem:[#allocation14 + $0x40] ss:$8 sps:$4 sm:$0xff]  }
 0xe61   :  { %v1675_v17 = vadd.f32 1e-05, %v1673_v16  ;;  %v3183_v16 = vld [vmem:[#allocation14 + $0x44] ss:$8 sps:$4 sm:$0xff]  }
 0xe62   :  { %v1672_v18 = vpop.xlane.xlu1 %1671 }
 0xe63   :  { %3233 = vrsqrt.f32 %v1675_v17  ;;  %v1674_v19 = vmul.f32 0.083333336, %v1672_v18  ;;  %v3184_v17 = vld [vmem:[#allocation13 + $0x20] sm:$0xff]   ;;  %v3187_v18 = vld [vmem:[#allocation14 + $0x34] ss:$8 sps:$4 sm:$0xff]  }
 0xe65   :  { %v1676_v20 = vadd.f32 1e-05, %v1674_v19  ;;  %v3185_v19 = vld [vmem:[#allocation14 + $0x30] ss:$8 sps:$4 sm:$0xff]  }
 0xe67   :  { %3235 = vrsqrt.f32 %v1676_v20  ;;  %v3188_v20 = vld [vmem:[#allocation13 + $0x18] sm:$0xff]  }
 0xe70   :  { %v3234_v21 = vpop.eup %3233 }
 0xe71   :  { %v1679_v22 = vmul.f32 %v3234_v21, %v1665_v61  ;;  %v3191_v21 = vld [vmem:[#allocation14 + $0x24] ss:$8 sps:$4 sm:$0xff]  }
 0xe73   :  { %v1685_v33 = vmul.f32 %v1684_v25, %v1679_v22  ;;  %v3189_v22 = vld [vmem:[#allocation14 + $0x20] ss:$8 sps:$4 sm:$0xff]  }
 0xe74   :  { %v3236_v27 = vpop.eup %3235 }
 0xe75   :  { %v1680_v28 = vmul.f32 %v3236_v27, %v1666_v2  ;;  %v1691_v38 = vadd.f32 %v1690_v36, %v1685_v33  ;;  %v3169_v2 = vld [vmem:[#allocation14 + $0x70] ss:$8 sps:$4 sm:$0xff]   ;;  %v3195_v27 = vld [vmem:[#allocation14 + $0x14] ss:$8 sps:$4 sm:$0xff]   ;;  %v3196_v33 = vld [vmem:[#allocation13 + $0x8] sm:$0xff]  }
 0xe77   :  { %v1686_v37 = vmul.f32 %v1684_v25, %v1680_v28  ;;  %v3192_v25 = vld [vmem:[#allocation13 + $0x10] sm:$0xff]  }
 0xe78   :  { %v3193_v28 = vld [vmem:[#allocation14 + $0x10] ss:$8 sps:$4 sm:$0xff]  }
 0xe79   :  { %v1692_v41 = vadd.f32 %v1690_v36, %v1686_v37  ;;  %v3199_v36 = vld [vmem:[#allocation14 + $0x4] ss:$8 sps:$4 sm:$0xff]   ;;  %v3197_v37 = vld [vmem:[#allocation14] ss:$8 sps:$4 sm:$0xff]  }
 0xe7b   :  { %v1693_v42 = vpack.c.bf16 %v1692_v41, %v1691_v38 }
 0xe7d   :  { %2951 = vmatmul.mubr.bf16.vlgmr.msra.gmra.mxu1 %v1693_v42 }
 0xe7e   :  { %2990 = vmatprep.mubr.msk.bf16.mxu1 %vm3478_vm0, %v3477_v1  ;;  %2975 = vmatpush3.bf16.msra.mxu1 %v3172_v8 }
 0xe7f   :  { %2976 = vmatprep.subr.bf16.mxu1 %v3477_v1 }
 0xe82   :  { %2977 = vmatpush3.bf16.msra.mxu1 %v3176_v13 }
 0xe83   :  { %2978 = vmatprep.subr.bf16.mxu1 %v3477_v1 }
 0xe86   :  { %2979 = vmatpush3.bf16.msra.mxu1 %v3180_v63 }
 0xe87   :  { %2980 = vmatprep.subr.bf16.mxu1 %v3477_v1 }
 0xe8a   :  { %2981 = vmatpush3.bf16.msra.mxu1 %v3184_v17 }
 0xe8b   :  { %2982 = vmatprep.subr.bf16.mxu1 %v3477_v1 }
 0xe8e   :  { %2983 = vmatpush3.bf16.msra.mxu1 %v3188_v20 }
 0xe8f   :  { %2984 = vmatprep.subr.bf16.mxu1 %v3477_v1 }
 0xe92   :  { %2985 = vmatpush3.bf16.msra.mxu1 %v3192_v25 }
 0xe93   :  { %2986 = vmatprep.subr.bf16.mxu1 %v3477_v1 }
 0xe96   :  { %2987 = vmatpush3.bf16.msra.mxu1 %v3196_v33 }
 0xe97   :  { %2988 = vmatprep.subr.bf16.mxu1 %v3477_v1 }
 0xf3d   :  { %v1780_v45 = vpop.f32.mrf.mxu1 }
 0xf3e   :  { %v1781_v47 = vadd.f32 %v1780_v45, %v1697_v39  ;;  %v1127_v45 = vld [vmem:[#allocation11 + $0x18] sm:$0xff] }
 0xf3f   :  { %v2952_v46 = vpop.f32.mrf.mxu1 }
 0xf40   :  { %v1787_v51 = vmax.f32 %v1781_v47, 0.0 }
 0xf41   :  { %v1783_v48 = vpop.f32.mrf.mxu1 }
 0xf42   :  { %v1784_v49 = vadd.f32 %v1783_v48, %v1697_v39  ;;  %v1912_v48 = vrot.slane %v1127_v45, %v3624_v35 }
 0xf43   :  { %v2953_v50 = vpop.f32.mrf.mxu1 }
 0xf44   :  { %v1788_v54 = vmax.f32 %v1784_v49, 0.0 }
 0xf46   :  { %v1789_v55 = vpack.c.bf16 %v1788_v54, %v1787_v51  ;;  %v1918_v51 = vrot.slane %v1127_v45, %v3617_v31 }
 0xf48   :  { %2971 = vmatmul.mubr.bf16.vlgmr.msra.gmra.mxu0 %v1789_v55 }
 0xf49   :  { %2160 = vmatprep.mubr.bf16.mxu0 %v3476_v0  ;;  %2129 = vmatpush1.bf16.msra.mxu0 %v3169_v2 }
 0xf4a   :  { %2130 = vmatprep.subr.bf16.mxu0 %v3175_v10 }
 0xf4d   :  { %2131 = vmatpush1.bf16.msra.mxu0 %v3173_v12 }
 0xf4e   :  { %2132 = vmatprep.subr.bf16.mxu0 %v3179_v32 }
 0xf51   :  { %2133 = vmatpush1.bf16.msra.mxu0 %v3177_v14 }
 0xf52   :  { %2134 = vmatprep.subr.bf16.mxu0 %v3183_v16 }
 0xf55   :  { %2135 = vmatpush1.bf16.msra.mxu0 %v3181_v15 }
 0xf56   :  { %2136 = vmatprep.subr.bf16.mxu0 %v3187_v18 }
 0xf59   :  { %2137 = vmatpush1.bf16.msra.mxu0 %v3185_v19 }
 0xf5a   :  { %2138 = vmatprep.subr.bf16.mxu0 %v3191_v21 }
 0xf5d   :  { %2139 = vmatpush1.bf16.msra.mxu0 %v3189_v22 }
 0xf5e   :  { %2140 = vmatprep.subr.bf16.mxu0 %v3195_v27 }
 0xf61   :  { %2141 = vmatpush1.bf16.msra.mxu0 %v3193_v28 }
 0xf62   :  { %2142 = vmatprep.subr.bf16.mxu0 %v3199_v36 }
 0xf65   :  { %2143 = vmatpush1.bf16.msra.mxu0 %v3197_v37  ;;  %v3201_v37 = vld [vmem:[#allocation16 + $0x38] sm:$0xff]  }
 0xf66   :  { %3018 = vmatprep.subr.bf16.mxu0 %v3477_v1 }
0x1008   :  { %v1876_v57 = vpop.f32.mrf.mxu0 }
0x1009   :  { %v1877_v58 = vadd.f32 %v1876_v57, %v1793_v56 }
0x100a   :  { %v2972_v59 = vpop.f32.mrf.mxu0 }
0x100b   :  { %v1883_v53 = vadd.f32 %v1877_v58, %v1691_v38  ;;  %v3200_v38 = vld [vmem:[#allocation13] sm:$0xff]  }
0x100c   :  { %v1879_v60 = vpop.f32.mrf.mxu0  ;;  %2989 = vmatpush3.bf16.msra.mxu1 %v3200_v38  ;;  %v3202_v38 = vld [vmem:[#allocation16 + $0x30] sm:$0xff]  }
0x100d   :  { %v1880_v61 = vadd.f32 %v1879_v60, %v1793_v56  ;;  %1885 = vadd.xlane.f32.xlu0 %v1883_v53  ;;  %2994 = vmatprep.subr.bf16.mxu1 %v3477_v1 }
0x100e   :  { %v2973_v9 = vpop.f32.mrf.mxu0 }
0x100f   :  { %v1884_v62 = vadd.f32 %v1880_v61, %v1692_v41  ;;  %2991 = vmatmul.mubr.bf16.vlgmr.msra.gmra.mxu1 %v3600_v26  ;;  %v3860_v61 = vld [vmem:[%s3909_s9] sm:$0xff]  ;;  %s3479_s9 = smov [#allocation17]  }
0x1010   :  { %2996 = vmatprep.mubr.msk.bf16.mxu1 %vm3478_vm0, %v3477_v1  ;;  %v2174_v9 = vrot.slane %v3860_v61, %v3617_v31  ;;  %v1941_v2 = vrot.slane %v3860_v61, %v3624_v35  ;;  %s2502_s23 = sshll.u32 %s3479_s9, 4  ;;  %s2503_s23 = int_to_ptr.vmem [resolvable:$true] %s2502_s23 }
0x1011   :  { %1887 = vadd.xlane.f32.xlu1 %v1884_v62  ;;  %s3429_s24 = scalar_lea.vmem %s2503_s23, 256  ;;  %p3434_p4 = scmp.lt.s32.totalorder %s2503_s23, %s2503_s23 }
0x1012   :  { %p3430_p3 = scmp.ne.s32.totalorder %s2503_s23, %s3429_s24  ;;  %p3435_p5 = scmp.lt.s32.totalorder %s3429_s24, %s3429_s24 }
0x1014   :  { %p3436_p6 = por %p3435_p5, %p3434_p4 }
0x1016   :  { %p3437_p7 = pnand %p3436_p6, %p3430_p3 }
0x1096   :  { %v1886_v4 = vpop.xlane.xlu0 %1885 }
0x1097   :  { %v1889_v0 = vmul.f32 0.083333336, %v1886_v4 }
0x1099   :  { %v1891_v23 = vsub.f32 %v1883_v53, %v1889_v0 }
0x109a   :  { %v1888_v30 = vpop.xlane.xlu1 %1887 }
0x109b   :  { %v1890_v5 = vmul.f32 0.083333336, %v1888_v30  ;;  %v3829_v3 = vsel %vm163_vm3, %v1891_v23, 0.0 }
0x109c   :  { %v1895_v11 = vmul.f32 %v3829_v3, %v3829_v3 }
0x109d   :  { %v1892_v6 = vsub.f32 %v1884_v62, %v1890_v5 }
0x109e   :  { %1897 = vadd.xlane.f32.xlu0 %v1895_v11  ;;  %v2180_v11 = vrot.slane %v3860_v61, %v3629_v40 }
0x109f   :  { %v3835_v7 = vsel %vm163_vm3, %v1892_v6, 0.0 }
0x10a0   :  { %v1896_v24 = vmul.f32 %v3835_v7, %v3835_v7 }
0x10a2   :  { %1899 = vadd.xlane.f32.xlu1 %v1896_v24 }
0x10cf   :  { %v2024_v58 = vpop.f32.mrf.mxu1 }
0x10d0   :  { %v2025_v23 = vadd.f32 %v2024_v58, %v1941_v2 }
0x10d1   :  { %v2992_v59 = vpop.f32.mrf.mxu1 }
0x10d3   :  { %v2027_v53 = vpop.f32.mrf.mxu1 }
0x10d4   :  { %v2028_v31 = vadd.f32 %v2027_v53, %v1941_v2 }
0x10d5   :  { %v2993_v60 = vpop.f32.mrf.mxu1 }
0x10d6   :  { %v2184_v24 = vpack.c.bf16 %v2028_v31, %v2028_v31 }
0x1127   :  { %v1898_v41 = vpop.xlane.xlu0 %1897 }
0x1128   :  { %v1901_v42 = vmul.f32 0.083333336, %v1898_v41  ;;  %v3203_v41 = vld [vmem:[#allocation16 + $0x28] sm:$0xff]  }
0x112a   :  { %v1903_v43 = vadd.f32 1e-05, %v1901_v42  ;;  %v3204_v42 = vld [vmem:[#allocation16 + $0x20] sm:$0xff]  }
0x112b   :  { %v1900_v34 = vpop.xlane.xlu1 %1899 }
0x112c   :  { %3237 = vrsqrt.f32 %v1903_v43  ;;  %v1902_v44 = vmul.f32 0.083333336, %v1900_v34  ;;  %v3205_v43 = vld [vmem:[#allocation16 + $0x18] sm:$0xff]  }
0x112e   :  { %v1904_v39 = vadd.f32 1e-05, %v1902_v44 }
0x1130   :  { %3239 = vrsqrt.f32 %v1904_v39 }
0x1139   :  { %v3238_v46 = vpop.eup %3237 }
0x113a   :  { %v1907_v47 = vmul.f32 %v3238_v46, %v3829_v3  ;;  %v2183_v3 = vpack.c.bf16 %v2025_v23, %v2025_v23 }
0x113c   :  { %v1913_v50 = vmul.f32 %v1912_v48, %v1907_v47 }
0x113d   :  { %v3240_v49 = vpop.eup %3239 }
0x113e   :  { %v1908_v26 = vmul.f32 %v3240_v49, %v3835_v7  ;;  %v1919_v55 = vadd.f32 %v1918_v51, %v1913_v50 }
0x1140   :  { %v1914_v54 = vmul.f32 %v1912_v48, %v1908_v26 }
0x1142   :  { %v1920_v56 = vadd.f32 %v1918_v51, %v1914_v54 }
0x1144   :  { %v2031_v57 = vpack.c.bf16 %v1920_v56, %v1919_v55  ;;  %v3206_v55 = vld [vmem:[#allocation16 + $0x10] sm:$0xff]   ;;  %v3207_v56 = vld [vmem:[#allocation16 + $0x8] sm:$0xff]  }
0x1146   :  { %2161 = vmatmul.mubr.bf16.vlgmr.msra.gmra.mxu0 %v2031_v57  ;;  %v3208_v57 = vld [vmem:[#allocation16] sm:$0xff]  }
0x1147   :  { %3034 = vmatprep.mubr.msk.bf16.mxu0 %vm3478_vm0, %v3477_v1  ;;  %3019 = vmatpush3.bf16.msra.mxu0 %v3201_v37 }
0x1148   :  { %3020 = vmatprep.subr.bf16.mxu0 %v3477_v1 }
0x114b   :  { %3021 = vmatpush3.bf16.msra.mxu0 %v3202_v38 }
0x114c   :  { %3022 = vmatprep.subr.bf16.mxu0 %v3477_v1 }
0x114f   :  { %3023 = vmatpush3.bf16.msra.mxu0 %v3203_v41 }
0x1150   :  { %3024 = vmatprep.subr.bf16.mxu0 %v3477_v1 }
0x1153   :  { %3025 = vmatpush3.bf16.msra.mxu0 %v3204_v42 }
0x1154   :  { %3026 = vmatprep.subr.bf16.mxu0 %v3477_v1 }
0x1157   :  { %3027 = vmatpush3.bf16.msra.mxu0 %v3205_v43 }
0x1158   :  { %3028 = vmatprep.subr.bf16.mxu0 %v3477_v1 }
0x115b   :  { %3029 = vmatpush3.bf16.msra.mxu0 %v3206_v55 }
0x115c   :  { %3030 = vmatprep.subr.bf16.mxu0 %v3477_v1 }
0x115f   :  { %3031 = vmatpush3.bf16.msra.mxu0 %v3207_v56 }
0x1160   :  { %3032 = vmatprep.subr.bf16.mxu0 %v3477_v1 }
0x1163   :  { %3033 = vmatpush3.bf16.msra.mxu0 %v3208_v57 }
0x1206   :  { %v2162_v62 = vpop.f32.mrf.mxu0 }
0x1207   :  { %v2175_v29 = vadd.f32 %v2174_v9, %v2162_v62 }
0x1208   :  { %v2164_v4 = vpop.f32.mrf.mxu0 }
0x1209   :  { %v2185_v0 = vpack.c.bf16 %v2175_v29, %v2175_v29  ;;  %v2181_v7 = vadd.f32 %v2180_v11, %v2164_v4 }
0x120a   :  { %v2166_v30 = vpop.f32.mrf.mxu0 }
0x120b   :  { %2995 = vmatpush3.bf16.xpose.msra.mxu1 %v2185_v0  ;;  %v2176_v5 = vadd.f32 %v2174_v9, %v2166_v30  ;;  %v2291_v35 = vpack.c.bf16 %v2181_v7, %v2181_v7  ;;  %v2405_v0 = vrot.slane %v3860_v61, %v3664_v52 }
0x120c   :  { %3000 = vmatprep.subr.bf16.mxu1 %v3477_v1  ;;  %v2168_v44 = vpop.f32.mrf.mxu0 }
0x120d   :  { %v2186_v6 = vpack.c.bf16 %v2176_v5, %v2176_v5  ;;  %v2297_v8 = vsel %vm591_vm1, %v2291_v35, 0  ;;  %v2182_v45 = vadd.f32 %v2180_v11, %v2168_v44 }
0x120f   :  { %v2292_v47 = vpack.c.bf16 %v2182_v45, %v2182_v45 }
0x1211   :  { %v2343_v26 = vsel %vm591_vm1, %v2292_v47, 0 }
0x1212   :  { %2997 = vmatmul.mubr.bf16.vlgmr.msra.gmra.mxu1 %v2183_v3 }
0x1213   :  { %3001 = vmatpush3.bf16.xpose.msra.mxu1 %v2186_v6  ;;  %3002 = vmatprep.mubr.msk.bf16.mxu1 %vm3478_vm0, %v3477_v1 }
0x1214   :  { %3006 = vmatprep.subr.bf16.mxu1 %v3477_v1 }
0x121a   :  { %3003 = vmatmul.mubr.bf16.vlgmr.msra.gmra.mxu1 %v2184_v24 }
0x121b   :  { %3007 = vmatpush3.bf16.msra.mxu1 %v2297_v8  ;;  %3008 = vmatprep.mubr.msk.bf16.mxu1 %vm3478_vm0, %v3477_v1 }
0x121c   :  { %3012 = vmatprep.subr.bf16.mxu1 %v3477_v1 }
0x12d2   :  { %v2221_v40 = vpop.f32.mrf.mxu1 }
0x12d3   :  { %v2267_v10 = vsel %vm561_vm2, %v2221_v40, -inf }
0x12d4   :  { %2268 = vmax.xlane.f32.xlu0 %v2267_v10  ;;  %v2998_v12 = vpop.f32.mrf.mxu1 }
0x12d6   :  { %v2224_v13 = vpop.f32.mrf.mxu1 }
0x12d8   :  { %v2999_v32 = vpop.f32.mrf.mxu1 }
0x12da   :  { %v2261_v14 = vpop.f32.mrf.mxu1 }
0x12db   :  { %v2270_v63 = vsel %vm561_vm2, %v2261_v14, -inf }
0x12dc   :  { %2271 = vmax.xlane.f32.xlu1 %v2270_v63  ;;  %v3004_v15 = vpop.f32.mrf.mxu1 }
0x12de   :  { %v2264_v16 = vpop.f32.mrf.mxu1 }
0x12e0   :  { %v3005_v17 = vpop.f32.mrf.mxu1 }
0x135d   :  { %v2269_v18 = vpop.xlane.xlu0 %2268 }
0x135e   :  { %v2273_v19 = vsub.f32 %v2221_v40, %v2269_v18 }
0x1360   :  { %v2275_v20 = vmul.f32 1.442695, %v2273_v19 }
0x1362   :  { %3241 = vpow2.f32 %v2275_v20 }
0x1365   :  { %v2272_v21 = vpop.xlane.xlu1 %2271 }
0x1366   :  { %v2274_v22 = vsub.f32 %v2261_v14, %v2272_v21 }
0x1368   :  { %v2277_v25 = vmul.f32 1.442695, %v2274_v22 }
0x136a   :  { %3243 = vpow2.f32 %v2277_v25 }
0x136f   :  { %v3242_v27 = vpop.eup %3241 }
0x1370   :  { %v2279_v28 = vsel %vm561_vm2, %v3242_v27, 0.0 }
0x1371   :  { %2280 = vadd.xlane.f32.xlu0 %v2279_v28 }
0x1377   :  { %v3244_v33 = vpop.eup %3243 }
0x1378   :  { %v2282_v36 = vsel %vm561_vm2, %v3244_v33, 0.0 }
0x1379   :  { %2283 = vadd.xlane.f32.xlu1 %v2282_v36 }
0x13fa   :  { %v2281_v34 = vpop.xlane.xlu0 %2280 }
0x13fb   :  { %3245 = vrcp.f32 %v2281_v34 }
0x1402   :  { %v2284_v39 = vpop.xlane.xlu1 %2283 }
0x1403   :  { %3247 = vrcp.f32 %v2284_v39 }
0x1408   :  { %v3246_v46 = vpop.eup %3245 }
0x1409   :  { %v2287_v48 = vmul.f32 %v3246_v46, %v3242_v27 }
0x140b   :  { %v2289_v49 = vpack.c.bf16 %v2287_v48, %v2287_v48 }
0x140d   :  { %3009 = vmatmul.mubr.msk.bf16.vlgmr.msra.gmra.mxu1 %vm561_vm2, %v2289_v49 }
0x140e   :  { %3013 = vmatpush3.bf16.msra.mxu1 %v2343_v26  ;;  %3014 = vmatprep.mubr.msk.bf16.mxu1 %vm3478_vm0, %v3477_v1 }
0x1410   :  { %v3248_v50 = vpop.eup %3247 }
0x1411   :  { %v2288_v51 = vmul.f32 %v3248_v50, %v3244_v33 }
0x1413   :  { %v2290_v54 = vpack.c.bf16 %v2288_v51, %v2288_v51 }
0x1415   :  { %3015 = vmatmul.mubr.msk.bf16.vlgmr.msra.gmra.mxu1 %vm561_vm2, %v2290_v54 }
0x14cd   :  { %v2333_v58 = vpop.f32.mrf.mxu1 }
0x14cf   :  { %v3010_v59 = vpop.f32.mrf.mxu1 }
0x14d1   :  { %v2336_v53 = vpop.f32.mrf.mxu1 }
0x14d3   :  { %v3011_v60 = vpop.f32.mrf.mxu1 }
0x14d5   :  { %v2379_v9 = vpop.f32.mrf.mxu1 }
0x14d6   :  { %v2385_v62 = vpack.c.bf16 %v2379_v9, %v2333_v58 }
0x14d7   :  { %v3016_v2 = vpop.f32.mrf.mxu1 }
0x14d8   :  { %3035 = vmatmul.mubr.bf16.vlgmr.msra.gmra.mxu0 %v2385_v62 }
0x14d9   :  { %v2382_v29 = vpop.f32.mrf.mxu1 }
0x14db   :  { %v3017_v4 = vpop.f32.mrf.mxu1 }
0x1598   :  { %v2488_v23 = vpop.f32.mrf.mxu0 }
0x1599   :  { %v2489_v30 = vadd.f32 %v2488_v23, %v2405_v0 }
0x159a   :  { %v3036_v5 = vpop.f32.mrf.mxu0 }
0x159b   :  { %2495 = vst [vmem:[#allocation17] sm:$0xff] %v2489_v30 }
0x159c   :  { %v2491_v1 = vpop.f32.mrf.mxu0 }
0x159d   :  { %v2492_v3 = vadd.f32 %v2491_v1, %v2405_v0 }
0x159e   :  { %v3037_v11 = vpop.f32.mrf.mxu0 }
0x159f   :  { %2496 = vst [vmem:[#allocation17 + $0x8] sm:$0xff] %v2492_v3 }
0x15a0   :  { %3440 = shalt.err (!%p3437_p7)
}
0x15a1   :  { %2508 = dma.vmem_to_hbm [thread:$0]  %s2503_s23, 256, %s3910_s10, [#allocation4], %s3469_s11, %s3469_s11, %s3470_s12  }
0x15a2   :  { %3459 = dma.done.wait [#allocation4], 256  }
0x15a3   :  { %3460 = vsyncadd [#allocation4], 4294967040 }
0x15a4   :  { %2512 = vsyncpa [#allocation3], 1 }
0x15a5   :  { %2513 = vsyncpa [#allocation6], 1 }
0x15a6   :  { %2514 = vsyncpa [#allocation9], 1 }
0x15a7   :  { %2515 = vsyncpa [#allocation12], 1 }
0x15a8   :  { %2516 = vsyncpa [#allocation15], 1 }
0x15a9   :  { %2517 = vsyncpa [#allocation4], 1 }

</bundles_post_ra>
